<compile_context>
chip_gen: v5e
topology: v5e:2x2
jax: 0.10.0
libtpu: 0.0.40
codegen_flags: <defaults>
</compile_context>

<pallas_src>
import functools
import math

import jax
import jax.numpy as jnp
from jax import lax
from jax.experimental import pallas as pl
from jax.experimental.pallas import tpu as pltpu

EPS = 1e-5


def _round_up(v, m):
    return (v + m - 1) // m * m


# ---------------------------------------------------------------------------
# Fused kernel: depthwise conv (+shift+ReLU) + pointwise 1x1 (+shift+ReLU)
# One grid step = one batch element x one tile of TR output rows.
# ---------------------------------------------------------------------------
def _fused_dsconv_kernel(x_ref, w_dw_ref, dw_shift_ref, w_pw_ref, pw_shift_ref,
                         o_ref, *, K):
    """Refs:
      x_ref:        (1, H_pad, W_pad, C)      whole padded image (resident)
      w_dw_ref:     (K*K, C)                  depthwise taps, BN1 scale folded
      dw_shift_ref: (1, C)                    folded conv1 bias + BN1 shift
      w_pw_ref:     (C, Cout_pad)             pointwise weight, BN2 scale folded
      pw_shift_ref: (1, Cout_pad)             folded conv2 bias + BN2 shift
      o_ref:        (1, Cout_pad, TR*WO_pad)  channel-major row tile
    """
    _, _, W_pad, C = x_ref.shape
    _, Cout_pad, rows = o_ref.shape
    WO_pad = W_pad - K + 1
    TR = rows // WO_pad                      # output rows per tile (static)

    row0 = pl.multiple_of(pl.program_id(1) * TR, TR)

    # Input slab for this row tile (+ K-1 halo rows).  Halo is free: the whole
    # image block is visible, we just slice the leading (cheap) dim.
    xt = x_ref[0, pl.ds(row0, TR + K - 1), :, :].astype(jnp.float32)
    w = w_dw_ref[...].astype(jnp.float32)    # (K*K, C), read once

    # Depthwise taps.  The W (sublane) axis is sliced once per kj; ki shifts
    # are free leading-dim slices.
    acc = None
    for kj in range(K):
        xs = xt[:, kj:kj + WO_pad, :]        # (TR+K-1, WO_pad, C)
        for ki in range(K):
            t = xs[ki:ki + TR] * w[ki * K + kj]
            acc = t if acc is None else acc + t

    # Depthwise bias + BN shift (scale already folded into w) + ReLU.
    d = jnp.maximum(acc + dw_shift_ref[...], 0.0)          # (TR, WO_pad, C)

    # Pointwise 1x1 conv as ONE MXU matmul over the whole row tile.
    # WO_pad % 8 == 0 -> this reshape is a layout-preserving re-tiling.
    d2 = d.reshape(TR * WO_pad, C)                          # (rows, C)
    y = jnp.dot(d2, w_pw_ref[...], preferred_element_type=jnp.float32)
    y = jnp.maximum(y + pw_shift_ref[...], 0.0)             # (rows, Cout_pad)

    # Fold the NHWC->NCHW transpose into the kernel: store channel-major.
    # Both dims are multiples of 128 -> friendly XLU transpose + dense stores.
    o_ref[0] = jnp.transpose(y, (1, 0)).astype(o_ref.dtype)


# ---------------------------------------------------------------------------
# Wrapper: BN folding, padding/layout, pallas_call
# ---------------------------------------------------------------------------
@functools.partial(jax.jit, static_argnames=("compute_dtype",))
def depth_separable_conv2d(x_nchw, w_dw, b_dw, bn1_g, bn1_b, bn1_m, bn1_v,
                           w_pw, b_pw, bn2_g, bn2_b, bn2_m, bn2_v,
                           compute_dtype=jnp.bfloat16):
    """Eval-mode forward of DepthSeperabelConv2d.

    x_nchw: (N, C, H, W) f32;  w_dw: (C, 1, K, K);  w_pw: (Cout, C, 1, 1)
    BN params are 1-D per-channel arrays.  Returns (N, Cout, H-K+1, W-K+1) f32.
    compute_dtype: dtype of the activations/depthwise weights fed to the
    kernel (bf16 halves HBM traffic; accumulation stays f32 in-kernel).
    """
    N, C, H, W = x_nchw.shape
    K = w_dw.shape[2]
    Cout = w_pw.shape[0]
    HO, WO = H - K + 1, W - K + 1

    # ---- static tiling ----------------------------------------------------
    WO_pad = _round_up(WO, 8)                      # free in-kernel flatten
    TR = 128 // math.gcd(WO_pad, 128)              # rows/tile: TR*WO_pad % 128 == 0
    HO_pad = _round_up(HO, TR)
    W_pad = WO_pad + K - 1
    H_pad = HO_pad + K - 1
    Cout_pad = _round_up(Cout, 128)                # lane-dense pointwise/store
    HT = HO_pad // TR
    ROWS = TR * WO_pad

    # ---- fold conv bias + eval-mode BN into weight scale + per-channel shift
    dw_s = bn1_g * lax.rsqrt(bn1_v + EPS)                                   # (C,)
    w_dw_kc = (jnp.transpose(w_dw[:, 0], (1, 2, 0)).reshape(K * K, C)
               * dw_s[None, :]).astype(compute_dtype)                       # (K*K, C)
    dw_shift = (bn1_b + dw_s * (b_dw - bn1_m)).reshape(1, C).astype(jnp.float32)

    pw_s = bn2_g * lax.rsqrt(bn2_v + EPS)                                   # (Cout,)
    w_pw_mat = (w_pw[:, :, 0, 0].T * pw_s[None, :]).astype(jnp.float32)     # (C, Cout)
    w_pw_mat = jnp.pad(w_pw_mat, ((0, 0), (0, Cout_pad - Cout)))
    pw_shift = jnp.pad(bn2_b + pw_s * (b_pw - bn2_m), (0, Cout_pad - Cout))
    pw_shift = pw_shift.reshape(1, Cout_pad).astype(jnp.float32)

    # NCHW -> NHWC, cast, zero-pad H/W so output rows/cols are tile aligned.
    # (XLA fuses transpose+cast+pad into one pass over x.)
    x = jnp.transpose(x_nchw, (0, 2, 3, 1)).astype(compute_dtype)
    x = jnp.pad(x, ((0, 0), (0, H_pad - H), (0, W_pad - W), (0, 0)))

    flops = 2 * N * HO_pad * WO_pad * C * (K * K + Cout_pad)
    bytes_accessed = (x.size * x.dtype.itemsize
                      + (w_dw_kc.size + w_pw_mat.size + dw_shift.size
                         + pw_shift.size) * 4
                      + N * Cout_pad * HO_pad * WO_pad * 4)

    in_block = H_pad * W_pad * C * jnp.dtype(compute_dtype).itemsize
    out_block = Cout_pad * ROWS * 4
    vmem_limit = int(min(max(4 * (in_block + out_block) + (2 << 20), 16 << 20),
                         48 << 20))

    out = pl.pallas_call(
        functools.partial(_fused_dsconv_kernel, K=K),
        out_shape=jax.ShapeDtypeStruct((N, Cout_pad, HO_pad * WO_pad),
                                       jnp.float32),
        grid=(N, HT),
        in_specs=[
            # Whole padded image per batch element; index does not depend on
            # the row-tile axis -> stays resident across row tiles.
            pl.BlockSpec((1, H_pad, W_pad, C), lambda n, t: (n, 0, 0, 0)),
            pl.BlockSpec((K * K, C), lambda n, t: (0, 0)),
            pl.BlockSpec((1, C), lambda n, t: (0, 0)),
            pl.BlockSpec((C, Cout_pad), lambda n, t: (0, 0)),
            pl.BlockSpec((1, Cout_pad), lambda n, t: (0, 0)),
        ],
        # Channel-major output; last dim (ROWS) is a multiple of 128.
        out_specs=pl.BlockSpec((1, Cout_pad, ROWS), lambda n, t: (n, 0, t)),
        compiler_params=pltpu.CompilerParams(
            dimension_semantics=("parallel", "parallel"),
            vmem_limit_bytes=vmem_limit),
        cost_estimate=pl.CostEstimate(flops=flops, transcendentals=0,
                                      bytes_accessed=bytes_accessed),
    )(x, w_dw_kc, dw_shift, w_pw_mat, pw_shift)

    # Kernel already produced channel-major data: only a (free) reshape and a
    # slice of the padding remain — no HBM transpose of the output.
    out = out.reshape(N, Cout_pad, HO_pad, WO_pad)
    return out[:, :Cout, :HO, :WO]


# ---------------------------------------------------------------------------
# Pure-JAX reference (mirrors the PyTorch module in eval mode)
# ---------------------------------------------------------------------------
def reference(x, w_dw, b_dw, g1, be1, m1, v1, w_pw, b_pw, g2, be2, m2, v2):
    C = x.shape[1]
    y = lax.conv_general_dilated(
        x, w_dw, window_strides=(1, 1), padding='VALID',
        feature_group_count=C,
        dimension_numbers=('NCHW', 'OIHW', 'NCHW'))
    y = y + b_dw[None, :, None, None]
    y = ((y - m1[None, :, None, None]) / jnp.sqrt(v1 + EPS)[None, :, None, None]
         * g1[None, :, None, None] + be1[None, :, None, None])
    y = jnp.maximum(y, 0.0)

    z = jnp.einsum('nchw,oc->nohw', y, w_pw[:, :, 0, 0]) + b_pw[None, :, None, None]
    z = ((z - m2[None, :, None, None]) / jnp.sqrt(v2 + EPS)[None, :, None, None]
         * g2[None, :, None, None] + be2[None, :, None, None])
    return jnp.maximum(z, 0.0)


# ---------------------------------------------------------------------------
if __name__ == "__main__":
    N, C_in, C_out, H, W, K = 2, 4, 8, 16, 16, 3

    key = jax.random.PRNGKey(0)
    ks = jax.random.split(key, 12)

    x = jax.random.normal(ks[0], (N, C_in, H, W), jnp.float32)

    # --- parameters (PyTorch shapes), deterministic ---
    w_dw = 0.1 * jax.random.normal(ks[1], (C_in, 1, K, K), jnp.float32)   # groups=C conv
    b_dw = 0.1 * jax.random.normal(ks[2], (C_in,), jnp.float32)
    g1 = 0.5 + jax.random.uniform(ks[3], (C_in,), jnp.float32)            # BN1 gamma
    be1 = 0.1 * jax.random.normal(ks[4], (C_in,), jnp.float32)            # BN1 beta
    m1 = 0.1 * jax.random.normal(ks[5], (C_in,), jnp.float32)             # BN1 running_mean
    v1 = 0.5 + jax.random.uniform(ks[6], (C_in,), jnp.float32)            # BN1 running_var

    w_pw = 0.1 * jax.random.normal(ks[7], (C_out, C_in, 1, 1), jnp.float32)
    b_pw = 0.1 * jax.random.normal(ks[8], (C_out,), jnp.float32)
    g2 = 0.5 + jax.random.uniform(ks[9], (C_out,), jnp.float32)
    be2 = 0.1 * jax.random.normal(ks[10], (C_out,), jnp.float32)
    m2 = 0.1 * jax.random.normal(ks[11], (C_out,), jnp.float32)
    v2 = 0.5 + jax.random.uniform(jax.random.fold_in(key, 99), (C_out,), jnp.float32)

    ref = reference(x, w_dw, b_dw, g1, be1, m1, v1, w_pw, b_pw, g2, be2, m2, v2)

    # 1) Exact-parity path (f32 activations) -> tight tolerance.
    out32 = depth_separable_conv2d(x, w_dw, b_dw, g1, be1, m1, v1,
                                   w_pw, b_pw, g2, be2, m2, v2,
                                   compute_dtype=jnp.float32)
    out32 = jax.block_until_ready(out32)
    assert out32.shape == (N, C_out, H - K + 1, W - K + 1), out32.shape
    err32 = float(jnp.max(jnp.abs(out32 - ref)))
    assert jnp.allclose(out32, ref, atol=1e-4, rtol=1e-4), err32

    # 2) Bandwidth-optimized default path (bf16 activations, f32 accumulation).
    out16 = depth_separable_conv2d(x, w_dw, b_dw, g1, be1, m1, v1,
                                   w_pw, b_pw, g2, be2, m2, v2)
    out16 = jax.block_until_ready(out16)
    assert out16.shape == (N, C_out, H - K + 1, W - K + 1), out16.shape
    err16 = float(jnp.max(jnp.abs(out16 - ref)))
    assert jnp.allclose(out16, ref, atol=5e-2, rtol=5e-2), err16

    print("KERNEL_OK")
</pallas_src>

<mosaic_0001>
module attributes {stable_mosaic.version = 11 : i64} {
  func.func @_fused_dsconv_kernel(%arg0: i32, %arg1: i32, %arg2: memref<1x18x18x4xf32, #tpu.memory_space<vmem>>, %arg3: memref<9x4xf32, #tpu.memory_space<vmem>>, %arg4: memref<1x4xf32, #tpu.memory_space<vmem>>, %arg5: memref<4x128xf32, #tpu.memory_space<vmem>>, %arg6: memref<1x128xf32, #tpu.memory_space<vmem>>, %arg7: memref<1x128x128xf32, #tpu.memory_space<vmem>>) attributes {dimension_semantics = [#tpu.dimension_semantics<parallel>, #tpu.dimension_semantics<parallel>], iteration_bounds = array<i64: 2, 2>, scalar_prefetch = 0 : i64, scratch_operands = 0 : i64, tpu.core_type = #tpu.core_type<tc>, window_params = [{transform_indices = @transform_0, window_bounds = array<i64: 1, 18, 18, 4>}, {pipeline_mode = #tpu.pipeline_mode<synchronous>, transform_indices = @transform_1, window_bounds = array<i64: 9, 4>}, {pipeline_mode = #tpu.pipeline_mode<synchronous>, transform_indices = @transform_2, window_bounds = array<i64: 1, 4>}, {pipeline_mode = #tpu.pipeline_mode<synchronous>, transform_indices = @transform_3, window_bounds = array<i64: 4, 128>}, {pipeline_mode = #tpu.pipeline_mode<synchronous>, transform_indices = @transform_4, window_bounds = array<i64: 1, 128>}, {transform_indices = @transform_5, window_bounds = array<i64: 1, 128, 128>}]} {
    %c8_i32 = arith.constant 8 : i32
    %0 = arith.muli %arg1, %c8_i32 : i32
    %1 = tpu.assume_multiple %0, 8 : i32
    %c0 = arith.constant 0 : index
    %2 = arith.index_cast %1 : i32 to index
    %c0_0 = arith.constant 0 : index
    %c0_1 = arith.constant 0 : index
    %3 = vector.load %arg2[%c0, %2, %c0_0, %c0_1] : memref<1x18x18x4xf32, #tpu.memory_space<vmem>>, vector<1x10x18x4xf32>
    %4 = vector.shape_cast %3 : vector<1x10x18x4xf32> to vector<10x18x4xf32>
    %c0_2 = arith.constant 0 : index
    %c0_3 = arith.constant 0 : index
    %5 = vector.load %arg3[%c0_2, %c0_3] : memref<9x4xf32, #tpu.memory_space<vmem>>, vector<9x4xf32>
    %6 = vector.extract_strided_slice %4 {offsets = [0, 0, 0], sizes = [10, 16, 4], strides = [1, 1, 1]} : vector<10x18x4xf32> to vector<10x16x4xf32>
    %7 = vector.extract_strided_slice %6 {offsets = [0, 0, 0], sizes = [8, 16, 4], strides = [1, 1, 1]} : vector<10x16x4xf32> to vector<8x16x4xf32>
    %8 = vector.extract_strided_slice %5 {offsets = [0, 0], sizes = [1, 4], strides = [1, 1]} : vector<9x4xf32> to vector<1x4xf32>
    %9 = vector.shape_cast %8 : vector<1x4xf32> to vector<4xf32>
    %10 = vector.shape_cast %9 : vector<4xf32> to vector<1x1x4xf32>
    %11 = vector.broadcast %10 : vector<1x1x4xf32> to vector<8x16x4xf32>
    %12 = arith.mulf %7, %11 : vector<8x16x4xf32>
    %13 = vector.extract_strided_slice %6 {offsets = [1, 0, 0], sizes = [8, 16, 4], strides = [1, 1, 1]} : vector<10x16x4xf32> to vector<8x16x4xf32>
    %14 = vector.extract_strided_slice %5 {offsets = [3, 0], sizes = [1, 4], strides = [1, 1]} : vector<9x4xf32> to vector<1x4xf32>
    %15 = vector.shape_cast %14 : vector<1x4xf32> to vector<4xf32>
    %16 = vector.shape_cast %15 : vector<4xf32> to vector<1x1x4xf32>
    %17 = vector.broadcast %16 : vector<1x1x4xf32> to vector<8x16x4xf32>
    %18 = arith.mulf %13, %17 : vector<8x16x4xf32>
    %19 = arith.addf %12, %18 : vector<8x16x4xf32>
    %20 = vector.extract_strided_slice %6 {offsets = [2, 0, 0], sizes = [8, 16, 4], strides = [1, 1, 1]} : vector<10x16x4xf32> to vector<8x16x4xf32>
    %21 = vector.extract_strided_slice %5 {offsets = [6, 0], sizes = [1, 4], strides = [1, 1]} : vector<9x4xf32> to vector<1x4xf32>
    %22 = vector.shape_cast %21 : vector<1x4xf32> to vector<4xf32>
    %23 = vector.shape_cast %22 : vector<4xf32> to vector<1x1x4xf32>
    %24 = vector.broadcast %23 : vector<1x1x4xf32> to vector<8x16x4xf32>
    %25 = arith.mulf %20, %24 : vector<8x16x4xf32>
    %26 = arith.addf %19, %25 : vector<8x16x4xf32>
    %27 = vector.extract_strided_slice %4 {offsets = [0, 1, 0], sizes = [10, 16, 4], strides = [1, 1, 1]} : vector<10x18x4xf32> to vector<10x16x4xf32>
    %28 = vector.extract_strided_slice %27 {offsets = [0, 0, 0], sizes = [8, 16, 4], strides = [1, 1, 1]} : vector<10x16x4xf32> to vector<8x16x4xf32>
    %29 = vector.extract_strided_slice %5 {offsets = [1, 0], sizes = [1, 4], strides = [1, 1]} : vector<9x4xf32> to vector<1x4xf32>
    %30 = vector.shape_cast %29 : vector<1x4xf32> to vector<4xf32>
    %31 = vector.shape_cast %30 : vector<4xf32> to vector<1x1x4xf32>
    %32 = vector.broadcast %31 : vector<1x1x4xf32> to vector<8x16x4xf32>
    %33 = arith.mulf %28, %32 : vector<8x16x4xf32>
    %34 = arith.addf %26, %33 : vector<8x16x4xf32>
    %35 = vector.extract_strided_slice %27 {offsets = [1, 0, 0], sizes = [8, 16, 4], strides = [1, 1, 1]} : vector<10x16x4xf32> to vector<8x16x4xf32>
    %36 = vector.extract_strided_slice %5 {offsets = [4, 0], sizes = [1, 4], strides = [1, 1]} : vector<9x4xf32> to vector<1x4xf32>
    %37 = vector.shape_cast %36 : vector<1x4xf32> to vector<4xf32>
    %38 = vector.shape_cast %37 : vector<4xf32> to vector<1x1x4xf32>
    %39 = vector.broadcast %38 : vector<1x1x4xf32> to vector<8x16x4xf32>
    %40 = arith.mulf %35, %39 : vector<8x16x4xf32>
    %41 = arith.addf %34, %40 : vector<8x16x4xf32>
    %42 = vector.extract_strided_slice %27 {offsets = [2, 0, 0], sizes = [8, 16, 4], strides = [1, 1, 1]} : vector<10x16x4xf32> to vector<8x16x4xf32>
    %43 = vector.extract_strided_slice %5 {offsets = [7, 0], sizes = [1, 4], strides = [1, 1]} : vector<9x4xf32> to vector<1x4xf32>
    %44 = vector.shape_cast %43 : vector<1x4xf32> to vector<4xf32>
    %45 = vector.shape_cast %44 : vector<4xf32> to vector<1x1x4xf32>
    %46 = vector.broadcast %45 : vector<1x1x4xf32> to vector<8x16x4xf32>
    %47 = arith.mulf %42, %46 : vector<8x16x4xf32>
    %48 = arith.addf %41, %47 : vector<8x16x4xf32>
    %49 = vector.extract_strided_slice %4 {offsets = [0, 2, 0], sizes = [10, 16, 4], strides = [1, 1, 1]} : vector<10x18x4xf32> to vector<10x16x4xf32>
    %50 = vector.extract_strided_slice %49 {offsets = [0, 0, 0], sizes = [8, 16, 4], strides = [1, 1, 1]} : vector<10x16x4xf32> to vector<8x16x4xf32>
    %51 = vector.extract_strided_slice %5 {offsets = [2, 0], sizes = [1, 4], strides = [1, 1]} : vector<9x4xf32> to vector<1x4xf32>
    %52 = vector.shape_cast %51 : vector<1x4xf32> to vector<4xf32>
    %53 = vector.shape_cast %52 : vector<4xf32> to vector<1x1x4xf32>
    %54 = vector.broadcast %53 : vector<1x1x4xf32> to vector<8x16x4xf32>
    %55 = arith.mulf %50, %54 : vector<8x16x4xf32>
    %56 = arith.addf %48, %55 : vector<8x16x4xf32>
    %57 = vector.extract_strided_slice %49 {offsets = [1, 0, 0], sizes = [8, 16, 4], strides = [1, 1, 1]} : vector<10x16x4xf32> to vector<8x16x4xf32>
    %58 = vector.extract_strided_slice %5 {offsets = [5, 0], sizes = [1, 4], strides = [1, 1]} : vector<9x4xf32> to vector<1x4xf32>
    %59 = vector.shape_cast %58 : vector<1x4xf32> to vector<4xf32>
    %60 = vector.shape_cast %59 : vector<4xf32> to vector<1x1x4xf32>
    %61 = vector.broadcast %60 : vector<1x1x4xf32> to vector<8x16x4xf32>
    %62 = arith.mulf %57, %61 : vector<8x16x4xf32>
    %63 = arith.addf %56, %62 : vector<8x16x4xf32>
    %64 = vector.extract_strided_slice %49 {offsets = [2, 0, 0], sizes = [8, 16, 4], strides = [1, 1, 1]} : vector<10x16x4xf32> to vector<8x16x4xf32>
    %65 = vector.extract_strided_slice %5 {offsets = [8, 0], sizes = [1, 4], strides = [1, 1]} : vector<9x4xf32> to vector<1x4xf32>
    %66 = vector.shape_cast %65 : vector<1x4xf32> to vector<4xf32>
    %67 = vector.shape_cast %66 : vector<4xf32> to vector<1x1x4xf32>
    %68 = vector.broadcast %67 : vector<1x1x4xf32> to vector<8x16x4xf32>
    %69 = arith.mulf %64, %68 : vector<8x16x4xf32>
    %70 = arith.addf %63, %69 : vector<8x16x4xf32>
    %c0_4 = arith.constant 0 : index
    %c0_5 = arith.constant 0 : index
    %71 = vector.load %arg4[%c0_4, %c0_5] : memref<1x4xf32, #tpu.memory_space<vmem>>, vector<1x4xf32>
    %72 = vector.shape_cast %71 : vector<1x4xf32> to vector<1x1x4xf32>
    %73 = vector.broadcast %72 : vector<1x1x4xf32> to vector<8x16x4xf32>
    %74 = arith.addf %70, %73 : vector<8x16x4xf32>
    %cst = arith.constant 0.000000e+00 : f32
    %75 = vector.broadcast %cst : f32 to vector<8x16x4xf32>
    %76 = arith.maximumf %74, %75 : vector<8x16x4xf32>
    %77 = vector.shape_cast %76 : vector<8x16x4xf32> to vector<128x4xf32>
    %c0_6 = arith.constant 0 : index
    %c0_7 = arith.constant 0 : index
    %78 = vector.load %arg5[%c0_6, %c0_7] : memref<4x128xf32, #tpu.memory_space<vmem>>, vector<4x128xf32>
    %cst_8 = arith.constant dense<0.000000e+00> : vector<128x128xf32>
    %79 = tpu.matmul %77, %78, %cst_8 {dimension_numbers = #tpu.dot_dimension_numbers<[1], [0], [0], [1], [0, 0, 1, 1], [], []>} : vector<128x4xf32>, vector<4x128xf32>, vector<128x128xf32> -> vector<128x128xf32>
    %c0_9 = arith.constant 0 : index
    %c0_10 = arith.constant 0 : index
    %80 = vector.load %arg6[%c0_9, %c0_10] : memref<1x128xf32, #tpu.memory_space<vmem>>, vector<1x128xf32>
    %81 = vector.broadcast %80 : vector<1x128xf32> to vector<128x128xf32>
    %82 = arith.addf %79, %81 : vector<128x128xf32>
    %cst_11 = arith.constant 0.000000e+00 : f32
    %83 = vector.broadcast %cst_11 : f32 to vector<128x128xf32>
    %84 = arith.maximumf %82, %83 : vector<128x128xf32>
    %85 = tpu.transpose %84, [1, 0] : vector<128x128xf32> -> vector<128x128xf32>
    %c0_12 = arith.constant 0 : index
    %c0_13 = arith.constant 0 : index
    %c0_14 = arith.constant 0 : index
    %86 = vector.load %arg7[%c0_12, %c0_13, %c0_14] : memref<1x128x128xf32, #tpu.memory_space<vmem>>, vector<1x128x128xf32>
    %87 = vector.shape_cast %86 : vector<1x128x128xf32> to vector<128x128xf32>
    %88 = vector.shape_cast %85 : vector<128x128xf32> to vector<1x128x128xf32>
    tpu.vector_store %arg7[%c0_12, %c0_13, %c0_14], %88 {strides = array<i32>} : memref<1x128x128xf32, #tpu.memory_space<vmem>>, vector<1x128x128xf32>,
    return
  }
  func.func @transform_0(%arg0: i32, %arg1: i32) -> (i32, i32, i32, i32) {
    %c0_i32 = arith.constant 0 : i32
    %c0_i32_0 = arith.constant 0 : i32
    %c0_i32_1 = arith.constant 0 : i32
    %c0_i32_2 = arith.constant 0 : i32
    return %arg0, %c0_i32, %c0_i32_0, %c0_i32_1 : i32, i32, i32, i32
  }
  func.func @transform_1(%arg0: i32, %arg1: i32) -> (i32, i32) {
    %c0_i32 = arith.constant 0 : i32
    %c0_i32_0 = arith.constant 0 : i32
    %c0_i32_1 = arith.constant 0 : i32
    return %c0_i32, %c0_i32_0 : i32, i32
  }
  func.func @transform_2(%arg0: i32, %arg1: i32) -> (i32, i32) {
    %c0_i32 = arith.constant 0 : i32
    %c0_i32_0 = arith.constant 0 : i32
    %c0_i32_1 = arith.constant 0 : i32
    return %c0_i32, %c0_i32_0 : i32, i32
  }
  func.func @transform_3(%arg0: i32, %arg1: i32) -> (i32, i32) {
    %c0_i32 = arith.constant 0 : i32
    %c0_i32_0 = arith.constant 0 : i32
    %c0_i32_1 = arith.constant 0 : i32
    return %c0_i32, %c0_i32_0 : i32, i32
  }
  func.func @transform_4(%arg0: i32, %arg1: i32) -> (i32, i32) {
    %c0_i32 = arith.constant 0 : i32
    %c0_i32_0 = arith.constant 0 : i32
    %c0_i32_1 = arith.constant 0 : i32
    return %c0_i32, %c0_i32_0 : i32, i32
  }
  func.func @transform_5(%arg0: i32, %arg1: i32) -> (i32, i32, i32) {
    %c0_i32 = arith.constant 0 : i32
    %c0_i32_0 = arith.constant 0 : i32
    return %arg0, %c0_i32, %arg1 : i32, i32, i32
  }
}

</mosaic_0001>

<bundles_post_ra>
// kernel: depth_separable_conv2d.1
= control target key start
LH: loop header
LB: loop body
LE: loop exit
PB: predicated region body
PF: predicated region fallthrough
CT: control target
= control target key end

     0   :  { %s1654_s18 = smov 0   ;;  %s1656_s19 = smov 0   ;;  %s2425_s0 = inlined_call_operand.vmem [shape: f32[2,18,18,4], index: 0, kind: input, shape index: {}]   ;;  %s2426_s1 = inlined_call_operand.vmem [shape: f32[9,4], index: 1, kind: input, shape index: {}]   ;;  %s2427_s2 = inlined_call_operand.vmem [shape: f32[1,4], index: 2, kind: input, shape index: {}]   ;;  %s2428_s3 = inlined_call_operand.vmem [shape: f32[4,128], index: 3, kind: input, shape index: {}]   ;;  %s2429_s4 = inlined_call_operand.vmem [shape: f32[1,128], index: 4, kind: input, shape index: {}]   ;;  %s2430_s5 = inlined_call_operand.vmem [shape: f32[2,128,256], index: 5, kind: output, shape index: {}]  }
   0x1   :  { %s1658_s20 = smov 0   ;;  %s1660_s21 = smov 0  }
   0x2   :  { %s1662_s22 = smov 0   ;;  %s1664_s23 = smov 0  }
   0x3   :  { %s1666_s24 = smov 0  }
   0x4 LB: > { %s24_s25 = sadd.s32 1, %s1614_s22  ;;  %s27_s26 = sadd.s32 1, %s1618_s23  ;;  %s1622_s24 = sphi %s1666_s24, %s15_s24   ;;  %s1618_s23 = sphi %s1664_s23, %s2437_s23   ;;  %s1614_s22 = sphi %s1662_s22, %s2436_s22   ;;  %s1610_s21 = sphi %s1660_s21, %s2435_s21   ;;  %s1606_s20 = sphi %s1658_s20, %s2434_s20   ;;  %s1602_s19 = sphi %s1656_s19, %s2433_s19   ;;  %s1598_s18 = sphi %s1654_s18, %s2432_s18  }
   0x5   : > { %p25_p0 = scmp.ge.s32.totalorder %s24_s25, 2  ;;  %s1472_s27 = sadd.s32 4294967295, %s1622_s24  }
   0x6   : > { %p156_p1 = scmp.ne.s32.totalorder %s1602_s19, %s1598_s18  ;;  %p157_p2 = scmp.eq.s32.totalorder %s1472_s27, 3 }
   0x7   : > { %s2439_s25 = smov (%p25_p0, %s24_s25), 0  ;;  %s2441_s26 = smov (!%p25_p0, %s27_s26), %s1618_s23 }
   0x8   : > { %s142_s28 = ssub.s32 %s1614_s22, %s2439_s25  ;;  %p29_p3 = scmp.ge.s32.totalorder %s2441_s26, 2 }
   0x9   : > { %p1476_p4 = scmp.ge.s32.totalorder %s1622_s24, 1  ;;  %p1700_p5 = por %p157_p2, %p156_p1 }
   0xa   : > { %p201_p6 = scmp.lt.s32.totalorder %s1622_s24, 5  ;;  %s2443_s26 = smov (%p29_p3, %s2441_s26), 0 }
   0xb   : > { %s141_s30 = ssub.s32 %s1618_s23, %s2443_s26  ;;  %s146_s7 = sadd.s32 1, %s1602_s19 }
   0xc   : > { %p202_p7 = pnand %p1476_p4, %p201_p6  ;;  %s143_s6 = sor.u32 %s142_s28, %s141_s30 }
   0xd   : > { %p144_p8 = scmp.eq.s32.totalorder %s143_s6, 0  ;;  %p228_p9 = scmp.lt.s32.totalorder (!%p202_p7), %s1610_s21, 1 }
   0xe   : > { %205 = sbr.rel (%p202_p7) target bundleno = 496 (0x1f0), region = 40  ;;  %s225_s16 = sand.u32 (!%p202_p7), 1, %s1598_s18  }
   0xf   : > { %s1711_s8 = scalar_select %p144_p8, %s1602_s19, %s146_s7  }
  0x10   : > { %s1480_s14 = smul.u32 (!%p202_p7), 192, %s1606_s20  ;;  %s1477_s17 = sshll.u32 (!%p202_p7), %s225_s16, 7 }
  0x13   : > { %v1115_v0 = vld [vmem:[%s2428_s3] sm:$0xf]  ;;  %vm1169_vm0 = vcmask 1043456   ;;  %s229_s11 = scalar_select %p228_p9, %s1610_s21, 1  ;;  %vm400_vm1 = vcmask 1046528   ;;  %vm764_vm2 = vcmask 1045504  }
  0x14   : > { %1481 = vmatpush.msk.msra.mxu0 %vm1169_vm0, %v1115_v0  ;;  %1503 = vmatpush.msk.msra.mxu1 %vm1169_vm0, %v1115_v0  ;;  %v266_v1 = vld [vmem:[%s2426_s1] sm:$0xff]  ;;  %v1777_v32 = vld [vmem:[%s2426_s1 + $0x8] ss:$0 sm:$0xff]  ;;  %vm1120_vm3 = vcmask 31744   ;;  %s1499_s18 = sshll.u32 (%p1700_p5), %s1610_s21, 5 }
  0x15   : > { %1504 = vmatpush.msk.msra.mxu2 %vm1169_vm0, %v1115_v0  ;;  %1505 = vmatpush.msk.msra.mxu3 %vm1169_vm0, %v1115_v0  ;;  %s1506_s15 = smul.u32 432, %s229_s11  ;;  %v1722_v2 = vperm.slane %v266_v1, 0  ;;  %v1724_v3 = vperm.slane %v266_v1, 3  ;;  %v1726_v4 = vperm.slane %v266_v1, 1  ;;  %v1731_v5 = vperm.slane %v266_v1, 6 }
  0x16   : > { %v1733_v6 = vperm.slane %v266_v1, 4  ;;  %v1737_v7 = vperm.slane %v266_v1, 7  ;;  %v1744_v11 = vperm.slane %v266_v1, 2  ;;  %v1746_v12 = vperm.slane %v266_v1, 5 }
  0x17   : > { %s232_s27 = scalar_lea.vmem %s2425_s0, %s1506_s15 }
  0x18   : > { %s1735_s28 = scalar_lea.vmem %s232_s27, %s1480_s14  ;;  %s2363_s27 = scalar_lea.vmem [#allocation2], %s1477_s17 }
  0x19   : > { %v236_v8 = vld [vmem:[%s1735_s28] sm:$0xff]  ;;  %v237_v9 = vld [vmem:[%s1735_s28 + $0x8] sm:$0xff]  ;;  %v1742_v10 = vld [vmem:[%s1735_s28 + $0x18] sm:$0xff] }
  0x1a   : > { %v1749_v13 = vld [vmem:[%s1735_s28 + $0x20] sm:$0xff]  ;;  %v1752_v14 = vld [vmem:[%s1735_s28 + $0x30] sm:$0xff]  ;;  %v1755_v15 = vld [vmem:[%s1735_s28 + $0x38] sm:$0xff]  ;;  %v269_v16 = vmul.f32 %v1722_v2, %v236_v8  ;;  %v270_v17 = vmul.f32 %v1722_v2, %v237_v9  ;;  %v286_v18 = vmul.f32 %v1724_v3, %v1742_v10  ;;  %v352_v19 = vmul.f32 %v1726_v4, %v236_v8 }
  0x1b   : > { %v319_v20 = vmul.f32 %v1731_v5, %v1752_v14  ;;  %v353_v21 = vmul.f32 %v1726_v4, %v237_v9  ;;  %v474_v22 = vmul.f32 %v1733_v6, %v1742_v10  ;;  %v475_v23 = vmul.f32 %v1733_v6, %v1749_v13  ;;  %v238_v45 = vld [vmem:[%s1735_s28 + $0x10] sm:$0x3]  ;;  %v1793_v49 = vld [vmem:[%s1735_s28 + $0x28] sm:$0x3]  ;;  %v1796_v50 = vld [vmem:[%s1735_s28 + $0x40] sm:$0x3] }
  0x1c   : > { %v302_v24 = vadd.f32 %v286_v18, %v269_v16  ;;  %v401_v25 = vrot.slane %v352_v19, 1  ;;  %v595_v26 = vmul.f32 %v1737_v7, %v1752_v14  ;;  %v596_v27 = vmul.f32 %v1737_v7, %v1755_v15 }
  0x1d   : > { %v402_v28 = vrot.slane %v353_v21, 1  ;;  %v522_v29 = vrot.slane %v474_v22, 1  ;;  %v523_v30 = vrot.slane %v475_v23, 1  ;;  %v716_v31 = vmul.f32 %v1744_v11, %v236_v8  ;;  %v1817_v23 = vld [vmem:[%s1735_s28 + $0x48] sm:$0xff] }
  0x1e   : > { %v335_v33 = vadd.f32 %v319_v20, %v302_v24  ;;  %v643_v34 = vrot.slane %v595_v26, 1  ;;  %v644_v35 = vrot.slane %v596_v27, 1  ;;  %v717_v36 = vmul.f32 %v1744_v11, %v237_v9  ;;  %v1824_v26 = vld [vmem:[%s2427_s2] ss:$0 sm:$0xff] }
  0x1f   : > { %v403_v37 = vsel %vm400_vm1, %v401_v25, %v402_v28  ;;  %v524_v38 = vsel %vm400_vm1, %v522_v29, %v523_v30  ;;  %v765_v39 = vrot.slane %v716_v31, 2  ;;  %v838_v40 = vmul.f32 %v1746_v12, %v1742_v10 }
  0x20   : > { %v457_v41 = vadd.f32 %v403_v37, %v335_v33  ;;  %v645_v42 = vsel %vm400_vm1, %v643_v34, %v644_v35  ;;  %v766_v43 = vrot.slane %v717_v36, 2  ;;  %v839_v44 = vmul.f32 %v1746_v12, %v1749_v13 }
  0x21   : > { %v886_v46 = vrot.slane %v838_v40, 2  ;;  %v959_v47 = vmul.f32 %v1777_v32, %v1752_v14  ;;  %v960_v48 = vmul.f32 %v1777_v32, %v1755_v15  ;;  %v287_v51 = vmul.f32 %v1724_v3, %v1749_v13 }
  0x22   : > { %v578_v52 = vadd.f32 %v524_v38, %v457_v41  ;;  %v767_v53 = vsel %vm764_vm2, %v765_v39, %v766_v43  ;;  %v887_v54 = vrot.slane %v839_v44, 2  ;;  %v320_v55 = vmul.f32 %v1731_v5, %v1755_v15 }
  0x23   : > { %v1007_v56 = vrot.slane %v959_v47, 2  ;;  %v1008_v57 = vrot.slane %v960_v48, 2  ;;  %v303_v58 = vadd.f32 %v287_v51, %v270_v17  ;;  %v354_v59 = vmul.f32 %v1726_v4, %v238_v45 }
  0x24   : > { %v699_v60 = vadd.f32 %v645_v42, %v578_v52  ;;  %v888_v61 = vsel %vm764_vm2, %v886_v46, %v887_v54  ;;  %v476_v62 = vmul.f32 %v1733_v6, %v1793_v49  ;;  %v597_v63 = vmul.f32 %v1737_v7, %v1796_v50 }
  0x25   : > { %v1009_v0 = vsel %vm764_vm2, %v1007_v56, %v1008_v57  ;;  %v336_v1 = vadd.f32 %v320_v55, %v303_v58  ;;  %v404_v8 = vrot.slane %v354_v59, 1  ;;  %v718_v9 = vmul.f32 %v1744_v11, %v238_v45 }
  0x26   : > { %v821_v16 = vadd.f32 %v767_v53, %v699_v60  ;;  %v525_v17 = vrot.slane %v476_v62, 1  ;;  %v646_v18 = vrot.slane %v597_v63, 1  ;;  %v840_v19 = vmul.f32 %v1746_v12, %v1793_v49 }
  0x27   : > { %v405_v20 = vsel %vm400_vm1, %v402_v28, %v404_v8  ;;  %v768_v21 = vrot.slane %v718_v9, 2  ;;  %v961_v22 = vmul.f32 %v1777_v32, %v1796_v50  ;;  %v271_v24 = vmul.f32 %v1722_v2, %v1742_v10 }
  0x28   : > { %v942_v25 = vadd.f32 %v888_v61, %v821_v16  ;;  %v458_v27 = vadd.f32 %v405_v20, %v336_v1  ;;  %v526_v29 = vsel %vm400_vm1, %v523_v30, %v525_v17  ;;  %v647_v28 = vsel %vm400_vm1, %v644_v35, %v646_v18  ;;  %v1838_v35 = vld [vmem:[%s1735_s28 + $0x50] sm:$0xff] }
  0x29   : > { %v769_v31 = vsel %vm764_vm2, %v766_v43, %v768_v21  ;;  %v889_v33 = vrot.slane %v840_v19, 2  ;;  %v1010_v34 = vrot.slane %v961_v22, 2  ;;  %v288_v36 = vmul.f32 %v1724_v3, %v1752_v14 }
  0x2a   : > { %v1063_v37 = vadd.f32 %v1009_v0, %v942_v25  ;;  %v579_v38 = vadd.f32 %v526_v29, %v458_v27  ;;  %v321_v39 = vmul.f32 %v1731_v5, %v1817_v23  ;;  %v355_v40 = vmul.f32 %v1726_v4, %v1742_v10 }
  0x2b   : > { %v890_v41 = vsel %vm764_vm2, %v887_v54, %v889_v33  ;;  %v1011_v30 = vsel %vm764_vm2, %v1008_v57, %v1010_v34  ;;  %v304_v42 = vadd.f32 %v288_v36, %v271_v24  ;;  %v1842_v43 = vmul.f32 %v1726_v4, %v1749_v13 }
  0x2c   : > { %v1083_v44 = vadd.f32 %v1824_v26, %v1063_v37  ;;  %v700_v45 = vadd.f32 %v647_v28, %v579_v38  ;;  %v406_v46 = vrot.slane %v355_v40, 1  ;;  %v477_v47 = vmul.f32 %v1733_v6, %v1752_v14 }
  0x2d   : > { %v337_v48 = vadd.f32 %v321_v39, %v304_v42  ;;  %v407_v51 = vrot.slane %v1842_v43, 1  ;;  %v478_v52 = vmul.f32 %v1733_v6, %v1755_v15  ;;  %v598_v53 = vmul.f32 %v1737_v7, %v1817_v23 }
  0x2e   : > { %v1099_v54 = vmax.f32 %v1083_v44, 0.0  ;;  %v822_v55 = vadd.f32 %v769_v31, %v700_v45  ;;  %v527_v56 = vrot.slane %v477_v47, 1  ;;  %v599_v57 = vmul.f32 %v1737_v7, %v1838_v35  ;;  %v1873_v31 = vld [vmem:[%s1735_s28 + $0x58] sm:$0x3] }
  0x2f   : > { %v408_v58 = vsel %vm400_vm1, %v406_v46, %v407_v51  ;;  %v528_v59 = vrot.slane %v478_v52, 1  ;;  %v648_v60 = vrot.slane %v598_v53, 1  ;;  %v719_v61 = vmul.f32 %v1744_v11, %v1742_v10 }
  0x30   : > { %1482 = vmatmul.msk.f32.vlgmr.msra.gmra.mxu0 %vm1120_vm3, %v1099_v54  ;;  %v943_v62 = vadd.f32 %v890_v41, %v822_v55  ;;  %v459_v63 = vadd.f32 %v408_v58, %v337_v48  ;;  %v649_v0 = vrot.slane %v599_v57, 1  ;;  %v720_v1 = vmul.f32 %v1744_v11, %v1749_v13 }
  0x31   : > { %v529_v8 = vsel %vm400_vm1, %v527_v56, %v528_v59  ;;  %v770_v9 = vrot.slane %v719_v61, 2  ;;  %v841_v16 = vmul.f32 %v1746_v12, %v1752_v14  ;;  %v842_v17 = vmul.f32 %v1746_v12, %v1755_v15  ;;  %v1898_v61 = vld [vmem:[%s1735_s28 + $0x60] sm:$0xff] }
  0x32   : > { %v1064_v18 = vadd.f32 %v1011_v30, %v943_v62  ;;  %v580_v10 = vadd.f32 %v529_v8, %v459_v63  ;;  %v650_v19 = vsel %vm400_vm1, %v648_v60, %v649_v0  ;;  %v771_v20 = vrot.slane %v720_v1, 2 }
  0x33   : > { %v891_v21 = vrot.slane %v841_v16, 2  ;;  %v892_v22 = vrot.slane %v842_v17, 2  ;;  %v962_v24 = vmul.f32 %v1777_v32, %v1817_v23  ;;  %v963_v25 = vmul.f32 %v1777_v32, %v1838_v35 }
  0x34   : > { %v1084_v27 = vadd.f32 %v1824_v26, %v1064_v18  ;;  %v701_v29 = vadd.f32 %v650_v19, %v580_v10  ;;  %v772_v28 = vsel %vm764_vm2, %v770_v9, %v771_v20  ;;  %v272_v33 = vmul.f32 %v1722_v2, %v1749_v13  ;;  %v1909_v10 = vld [vmem:[%s1735_s28 + $0x68] sm:$0xff] }
  0x35   : > { %v893_v34 = vsel %vm764_vm2, %v891_v21, %v892_v22  ;;  %v1012_v36 = vrot.slane %v962_v24, 2  ;;  %v1013_v37 = vrot.slane %v963_v25, 2  ;;  %v289_v38 = vmul.f32 %v1724_v3, %v1755_v15 }
  0x36   : > { %v1100_v39 = vmax.f32 %v1084_v27, 0.0  ;;  %v823_v40 = vadd.f32 %v772_v28, %v701_v29  ;;  %v322_v41 = vmul.f32 %v1731_v5, %v1838_v35  ;;  %v357_v30 = vmul.f32 %v1726_v4, %v1793_v49 }
  0x37   : > { %v1014_v42 = vsel %vm764_vm2, %v1012_v36, %v1013_v37  ;;  %v305_v43 = vadd.f32 %v289_v38, %v272_v33  ;;  %v479_v13 = vmul.f32 %v1733_v6, %v1796_v50  ;;  %v600_v44 = vmul.f32 %v1737_v7, %v1873_v31 }
  0x38   : > { %1483 = vmatmul.msk.f32.gmra.mxu0 %vm1120_vm3, %v1100_v39  ;;  %v944_v45 = vadd.f32 %v893_v34, %v823_v40  ;;  %v409_v46 = vrot.slane %v357_v30, 1  ;;  %v721_v47 = vmul.f32 %v1744_v11, %v1793_v49  ;;  %v843_v48 = vmul.f32 %v1746_v12, %v1796_v50 }
  0x39   : > { %v338_v52 = vadd.f32 %v322_v41, %v305_v43  ;;  %v530_v53 = vrot.slane %v479_v13, 1  ;;  %v651_v54 = vrot.slane %v600_v44, 1  ;;  %v964_v55 = vmul.f32 %v1777_v32, %v1873_v31 }
  0x3a   : > { %v1065_v56 = vadd.f32 %v1014_v42, %v944_v45  ;;  %v410_v57 = vsel %vm400_vm1, %v407_v51, %v409_v46  ;;  %v773_v58 = vrot.slane %v721_v47, 2  ;;  %v894_v60 = vrot.slane %v843_v48, 2 }
  0x3b   : > { %v460_v62 = vadd.f32 %v410_v57, %v338_v52  ;;  %v531_v49 = vsel %vm400_vm1, %v528_v59, %v530_v53  ;;  %v652_v63 = vsel %vm400_vm1, %v649_v0, %v651_v54  ;;  %v1015_v1 = vrot.slane %v964_v55, 2 }
  0x3c   : > { %v1085_v8 = vadd.f32 %v1824_v26, %v1065_v56  ;;  %v774_v9 = vsel %vm764_vm2, %v771_v20, %v773_v58  ;;  %v895_v16 = vsel %vm764_vm2, %v892_v22, %v894_v60  ;;  %v273_v17 = vmul.f32 %v1722_v2, %v1752_v14 }
  0x3d   : > { %v581_v51 = vadd.f32 %v531_v49, %v460_v62  ;;  %v1016_v18 = vsel %vm764_vm2, %v1013_v37, %v1015_v1  ;;  %v290_v59 = vmul.f32 %v1724_v3, %v1817_v23  ;;  %v323_v0 = vmul.f32 %v1731_v5, %v1898_v61 }
  0x3e   : > { %v1101_v19 = vmax.f32 %v1085_v8, 0.0  ;;  %v358_v20 = vmul.f32 %v1726_v4, %v1752_v14  ;;  %v359_v21 = vmul.f32 %v1726_v4, %v1755_v15  ;;  %v480_v22 = vmul.f32 %v1733_v6, %v1817_v23  ;;  %v1948_v8 = vld [vmem:[%s1735_s28 + $0x70] sm:$0x3] }
  0x3f   : > { %v702_v24 = vadd.f32 %v652_v63, %v581_v51  ;;  %v306_v25 = vadd.f32 %v290_v59, %v273_v17  ;;  %v481_v27 = vmul.f32 %v1733_v6, %v1838_v35  ;;  %v601_v29 = vmul.f32 %v1737_v7, %v1898_v61 }
  0x40   : > { %1484 = vmatmul.msk.f32.gmra.mxu0 %vm1120_vm3, %v1101_v19  ;;  %v411_v28 = vrot.slane %v358_v20, 1  ;;  %v412_v33 = vrot.slane %v359_v21, 1  ;;  %v532_v34 = vrot.slane %v480_v22, 1  ;;  %v602_v36 = vmul.f32 %v1737_v7, %v1909_v10 }
  0x41   : > { %v824_v37 = vadd.f32 %v774_v9, %v702_v24  ;;  %v339_v38 = vadd.f32 %v323_v0, %v306_v25  ;;  %v533_v39 = vrot.slane %v481_v27, 1  ;;  %v653_v40 = vrot.slane %v601_v29, 1 }
  0x42   : > { %v413_v41 = vsel %vm400_vm1, %v411_v28, %v412_v33  ;;  %v654_v30 = vrot.slane %v602_v36, 1  ;;  %v722_v42 = vmul.f32 %v1744_v11, %v1752_v14  ;;  %v723_v43 = vmul.f32 %v1744_v11, %v1755_v15 }
  0x43   : > { %v945_v13 = vadd.f32 %v895_v16, %v824_v37  ;;  %v461_v44 = vadd.f32 %v413_v41, %v339_v38  ;;  %v534_v45 = vsel %vm400_vm1, %v532_v34, %v533_v39  ;;  %v844_v46 = vmul.f32 %v1746_v12, %v1817_v23 }
  0x44   : > { %v655_v47 = vsel %vm400_vm1, %v653_v40, %v654_v30  ;;  %v775_v48 = vrot.slane %v722_v42, 2  ;;  %v776_v52 = vrot.slane %v723_v43, 2  ;;  %v845_v53 = vmul.f32 %v1746_v12, %v1838_v35  ;;  %v1972_v43 = vld [vmem:[%s1735_s28 + $0x78] sm:$0xff] }
  0x45   : > { %v1066_v54 = vadd.f32 %v1016_v18, %v945_v13  ;;  %v582_v14 = vadd.f32 %v534_v45, %v461_v44  ;;  %v896_v55 = vrot.slane %v844_v46, 2  ;;  %v965_v56 = vmul.f32 %v1777_v32, %v1898_v61 }
  0x46   : > { %v777_v57 = vsel %vm764_vm2, %v775_v48, %v776_v52  ;;  %v897_v58 = vrot.slane %v845_v53, 2  ;;  %v966_v60 = vmul.f32 %v1777_v32, %v1909_v10  ;;  %v274_v62 = vmul.f32 %v1722_v2, %v1755_v15 }
  0x47   : > { %v1086_v49 = vadd.f32 %v1824_v26, %v1066_v54  ;;  %v703_v63 = vadd.f32 %v655_v47, %v582_v14  ;;  %v1017_v1 = vrot.slane %v965_v56, 2  ;;  %v291_v9 = vmul.f32 %v1724_v3, %v1838_v35  ;;  %v1984_v54 = vld [vmem:[%s1735_s28 + $0x80] sm:$0xff] }
  0x48   : > { %v898_v16 = vsel %vm764_vm2, %v896_v55, %v897_v58  ;;  %v1018_v17 = vrot.slane %v966_v60, 2  ;;  %v324_v51 = vmul.f32 %v1731_v5, %v1909_v10  ;;  %v360_v18 = vmul.f32 %v1726_v4, %v1796_v50 }
  0x49   : > { %v1102_v59 = vmax.f32 %v1086_v49, 0.0  ;;  %v825_v15 = vadd.f32 %v777_v57, %v703_v63  ;;  %v307_v0 = vadd.f32 %v291_v9, %v274_v62  ;;  %v482_v19 = vmul.f32 %v1733_v6, %v1873_v31 }
  0x4a   : > { %v1019_v20 = vsel %vm764_vm2, %v1017_v1, %v1018_v17  ;;  %v414_v21 = vrot.slane %v360_v18, 1  ;;  %v603_v22 = vmul.f32 %v1737_v7, %v1948_v8  ;;  %v724_v24 = vmul.f32 %v1744_v11, %v1796_v50 }
  0x4b   : > { %1485 = vmatmul.msk.f32.gmra.mxu0 %vm1120_vm3, %v1102_v59  ;;  %v946_v25 = vadd.f32 %v898_v16, %v825_v15  ;;  %v340_v27 = vadd.f32 %v324_v51, %v307_v0  ;;  %v535_v29 = vrot.slane %v482_v19, 1  ;;  %v846_v28 = vmul.f32 %v1746_v12, %v1873_v31 }
  0x4c   : > { %v415_v34 = vsel %vm400_vm1, %v412_v33, %v414_v21  ;;  %v656_v36 = vrot.slane %v603_v22, 1  ;;  %v778_v37 = vrot.slane %v724_v24, 2  ;;  %v967_v38 = vmul.f32 %v1777_v32, %v1948_v8 }
  0x4d   : > { %v1067_v40 = vadd.f32 %v1019_v20, %v946_v25  ;;  %v462_v41 = vadd.f32 %v415_v34, %v340_v27  ;;  %v536_v50 = vsel %vm400_vm1, %v533_v39, %v535_v29  ;;  %v899_v42 = vrot.slane %v846_v28, 2 }
  0x4e   : > { %v657_v13 = vsel %vm400_vm1, %v654_v30, %v656_v36  ;;  %v779_v44 = vsel %vm764_vm2, %v776_v52, %v778_v37  ;;  %v1020_v45 = vrot.slane %v967_v38, 2  ;;  %v275_v33 = vmul.f32 %v1722_v2, %v1817_v23 }
  0x4f   : > { %v1087_v46 = vadd.f32 %v1824_v26, %v1067_v40  ;;  %v583_v47 = vadd.f32 %v536_v50, %v462_v41  ;;  %v900_v48 = vsel %vm764_vm2, %v897_v58, %v899_v42  ;;  %v292_v53 = vmul.f32 %v1724_v3, %v1898_v61 }
  0x50   : > { %v1021_v39 = vsel %vm764_vm2, %v1018_v17, %v1020_v45  ;;  %v325_v30 = vmul.f32 %v1731_v5, %v1972_v43  ;;  %v361_v52 = vmul.f32 %v1726_v4, %v1817_v23  ;;  %v1992_v14 = vmul.f32 %v1726_v4, %v1838_v35 }
  0x51   : > { %v1103_v55 = vmax.f32 %v1087_v46, 0.0  ;;  %v704_v56 = vadd.f32 %v657_v13, %v583_v47  ;;  %v308_v57 = vadd.f32 %v292_v53, %v275_v33  ;;  %v483_v58 = vmul.f32 %v1733_v6, %v1898_v61  ;;  %v2022_v13 = vld [vmem:[%s1735_s28 + $0x88] sm:$0x3] }
  0x52   : > { %v416_v60 = vrot.slane %v361_v52, 1  ;;  %v417_v62 = vrot.slane %v1992_v14, 1  ;;  %v484_v49 = vmul.f32 %v1733_v6, %v1909_v10  ;;  %v604_v63 = vmul.f32 %v1737_v7, %v1972_v43 }
  0x53   : > { %1486 = vmatmul.msk.f32.vlgmr.msra.gmra.mxu1 %vm1120_vm3, %v1103_v55  ;;  %v826_v1 = vadd.f32 %v779_v44, %v704_v56  ;;  %v341_v9 = vadd.f32 %v325_v30, %v308_v57  ;;  %v537_v16 = vrot.slane %v483_v58, 1  ;;  %v605_v17 = vmul.f32 %v1737_v7, %v1984_v54 }
  0x54   : > { %v418_v51 = vsel %vm400_vm1, %v416_v60, %v417_v62  ;;  %v538_v18 = vrot.slane %v484_v49, 1  ;;  %v658_v59 = vrot.slane %v604_v63, 1  ;;  %v725_v15 = vmul.f32 %v1744_v11, %v1817_v23 }
  0x55   : > { %v947_v0 = vadd.f32 %v900_v48, %v826_v1  ;;  %v463_v19 = vadd.f32 %v418_v51, %v341_v9  ;;  %v659_v20 = vrot.slane %v605_v17, 1  ;;  %v726_v21 = vmul.f32 %v1744_v11, %v1838_v35 }
  0x56   : > { %v539_v22 = vsel %vm400_vm1, %v537_v16, %v538_v18  ;;  %v780_v24 = vrot.slane %v725_v15, 2  ;;  %v847_v25 = vmul.f32 %v1746_v12, %v1898_v61  ;;  %v848_v27 = vmul.f32 %v1746_v12, %v1909_v10  ;;  %v2047_v15 = vld [vmem:[%s1735_s28 + $0x90] sm:$0xff] }
  0x57   : > { %v1068_v29 = vadd.f32 %v1021_v39, %v947_v0  ;;  %v584_v28 = vadd.f32 %v539_v22, %v463_v19  ;;  %v660_v23 = vsel %vm400_vm1, %v658_v59, %v659_v20  ;;  %v781_v34 = vrot.slane %v726_v21, 2 }
  0x58   : > { %v901_v36 = vrot.slane %v847_v25, 2  ;;  %v902_v37 = vrot.slane %v848_v27, 2  ;;  %v968_v38 = vmul.f32 %v1777_v32, %v1972_v43  ;;  %v969_v40 = vmul.f32 %v1777_v32, %v1984_v54 }
  0x59   : > { %v1088_v41 = vadd.f32 %v1824_v26, %v1068_v29  ;;  %v705_v50 = vadd.f32 %v660_v23, %v584_v28  ;;  %v782_v42 = vsel %vm764_vm2, %v780_v24, %v781_v34  ;;  %v276_v44 = vmul.f32 %v1722_v2, %v1838_v35  ;;  %v2058_v28 = vld [vmem:[%s1735_s28 + $0x98] sm:$0xff] }
  0x5a   : > { %v903_v45 = vsel %vm764_vm2, %v901_v36, %v902_v37  ;;  %v1022_v33 = vrot.slane %v968_v38, 2  ;;  %v1023_v46 = vrot.slane %v969_v40, 2  ;;  %v293_v47 = vmul.f32 %v1724_v3, %v1909_v10 }
  0x5b   : > { %v1104_v48 = vmax.f32 %v1088_v41, 0.0  ;;  %v827_v53 = vadd.f32 %v782_v42, %v705_v50  ;;  %v326_v39 = vmul.f32 %v1731_v5, %v1984_v54  ;;  %v363_v30 = vmul.f32 %v1726_v4, %v1873_v31 }
  0x5c   : > { %v1024_v52 = vsel %vm764_vm2, %v1022_v33, %v1023_v46  ;;  %v309_v14 = vadd.f32 %v293_v47, %v276_v44  ;;  %v485_v35 = vmul.f32 %v1733_v6, %v1948_v8  ;;  %v606_v55 = vmul.f32 %v1737_v7, %v2022_v13 }
  0x5d   : > { %1487 = vmatmul.msk.f32.gmra.mxu1 %vm1120_vm3, %v1104_v48  ;;  %v948_v56 = vadd.f32 %v903_v45, %v827_v53  ;;  %v419_v57 = vrot.slane %v363_v30, 1  ;;  %v727_v58 = vmul.f32 %v1744_v11, %v1873_v31  ;;  %v849_v60 = vmul.f32 %v1746_v12, %v1948_v8 }
  0x5e   : > { %v342_v49 = vadd.f32 %v326_v39, %v309_v14  ;;  %v540_v63 = vrot.slane %v485_v35, 1  ;;  %v661_v1 = vrot.slane %v606_v55, 1  ;;  %v970_v9 = vmul.f32 %v1777_v32, %v2022_v13 }
  0x5f   : > { %v1069_v16 = vadd.f32 %v1024_v52, %v948_v56  ;;  %v420_v17 = vsel %vm400_vm1, %v417_v62, %v419_v57  ;;  %v783_v51 = vrot.slane %v727_v58, 2  ;;  %v904_v59 = vrot.slane %v849_v60, 2 }
  0x60   : > { %v464_v0 = vadd.f32 %v420_v17, %v342_v49  ;;  %v541_v31 = vsel %vm400_vm1, %v538_v18, %v540_v63  ;;  %v662_v19 = vsel %vm400_vm1, %v659_v20, %v661_v1  ;;  %v1025_v21 = vrot.slane %v970_v9, 2 }
  0x61   : > { %v1089_v22 = vadd.f32 %v1824_v26, %v1069_v16  ;;  %v784_v24 = vsel %vm764_vm2, %v781_v34, %v783_v51  ;;  %v905_v25 = vsel %vm764_vm2, %v902_v37, %v904_v59  ;;  %v277_v27 = vmul.f32 %v1722_v2, %v1898_v61 }
  0x62   : > { %v585_v62 = vadd.f32 %v541_v31, %v464_v0  ;;  %v1026_v29 = vsel %vm764_vm2, %v1023_v46, %v1025_v21  ;;  %v294_v18 = vmul.f32 %v1724_v3, %v1972_v43  ;;  %v327_v20 = vmul.f32 %v1731_v5, %v2047_v15 }
  0x63   : > { %v1105_v23 = vmax.f32 %v1089_v22, 0.0  ;;  %v364_v34 = vmul.f32 %v1726_v4, %v1898_v61  ;;  %v365_v36 = vmul.f32 %v1726_v4, %v1909_v10  ;;  %v486_v37 = vmul.f32 %v1733_v6, %v1972_v43  ;;  %v2097_v22 = vld [vmem:[%s1735_s28 + $0xa0] sm:$0x3] }
  0x64   : > { %v706_v38 = vadd.f32 %v662_v19, %v585_v62  ;;  %v310_v40 = vadd.f32 %v294_v18, %v277_v27  ;;  %v487_v41 = vmul.f32 %v1733_v6, %v1984_v54  ;;  %v607_v50 = vmul.f32 %v1737_v7, %v2047_v15 }
  0x65   : > { %1488 = vmatmul.msk.f32.gmra.mxu1 %vm1120_vm3, %v1105_v23  ;;  %v421_v42 = vrot.slane %v364_v34, 1  ;;  %v422_v44 = vrot.slane %v365_v36, 1  ;;  %v542_v45 = vrot.slane %v486_v37, 1  ;;  %v608_v33 = vmul.f32 %v1737_v7, %v2058_v28 }
  0x66   : > { %v828_v46 = vadd.f32 %v784_v24, %v706_v38  ;;  %v343_v47 = vadd.f32 %v327_v20, %v310_v40  ;;  %v543_v48 = vrot.slane %v487_v41, 1  ;;  %v663_v53 = vrot.slane %v607_v50, 1 }
  0x67   : > { %v423_v39 = vsel %vm400_vm1, %v421_v42, %v422_v44  ;;  %v664_v30 = vrot.slane %v608_v33, 1  ;;  %v728_v52 = vmul.f32 %v1744_v11, %v1898_v61  ;;  %v729_v14 = vmul.f32 %v1744_v11, %v1909_v10 }
  0x68   : > { %v949_v35 = vadd.f32 %v905_v25, %v828_v46  ;;  %v465_v55 = vadd.f32 %v423_v39, %v343_v47  ;;  %v544_v56 = vsel %vm400_vm1, %v542_v45, %v543_v48  ;;  %v850_v57 = vmul.f32 %v1746_v12, %v1972_v43 }
  0x69   : > { %v665_v58 = vsel %vm400_vm1, %v663_v53, %v664_v30  ;;  %v785_v60 = vrot.slane %v728_v52, 2  ;;  %v786_v49 = vrot.slane %v729_v14, 2  ;;  %v851_v63 = vmul.f32 %v1746_v12, %v1984_v54  ;;  %v2121_v14 = vld [vmem:[%s1735_s28 + $0xa8] sm:$0xff] }
  0x6a   : > { %v1070_v1 = vadd.f32 %v1026_v29, %v949_v35  ;;  %v586_v61 = vadd.f32 %v544_v56, %v465_v55  ;;  %v906_v9 = vrot.slane %v850_v57, 2  ;;  %v971_v16 = vmul.f32 %v1777_v32, %v2047_v15 }
  0x6b   : > { %v787_v17 = vsel %vm764_vm2, %v785_v60, %v786_v49  ;;  %v907_v51 = vrot.slane %v851_v63, 2  ;;  %v972_v59 = vmul.f32 %v1777_v32, %v2058_v28  ;;  %v278_v0 = vmul.f32 %v1722_v2, %v1909_v10 }
  0x6c   : > { %v1090_v31 = vadd.f32 %v1824_v26, %v1070_v1  ;;  %v707_v19 = vadd.f32 %v665_v58, %v586_v61  ;;  %v1027_v21 = vrot.slane %v971_v16, 2  ;;  %v295_v24 = vmul.f32 %v1724_v3, %v1984_v54  ;;  %v2133_v1 = vld [vmem:[%s1735_s28 + $0xb0] sm:$0xff] }
  0x6d   : > { %v908_v25 = vsel %vm764_vm2, %v906_v9, %v907_v51  ;;  %v1028_v27 = vrot.slane %v972_v59, 2  ;;  %v328_v62 = vmul.f32 %v1731_v5, %v2058_v28  ;;  %v366_v29 = vmul.f32 %v1726_v4, %v1948_v8 }
  0x6e   : > { %v1106_v18 = vmax.f32 %v1090_v31, 0.0  ;;  %v829_v10 = vadd.f32 %v787_v17, %v707_v19  ;;  %v311_v20 = vadd.f32 %v295_v24, %v278_v0  ;;  %v488_v23 = vmul.f32 %v1733_v6, %v2022_v13 }
  0x6f   : > { %v1029_v34 = vsel %vm764_vm2, %v1027_v21, %v1028_v27  ;;  %v424_v36 = vrot.slane %v366_v29, 1  ;;  %v609_v37 = vmul.f32 %v1737_v7, %v2097_v22  ;;  %v730_v38 = vmul.f32 %v1744_v11, %v1948_v8 }
  0x70   : > { %1489 = vmatmul.msk.f32.gmra.mxu1 %vm1120_vm3, %v1106_v18  ;;  %v950_v40 = vadd.f32 %v908_v25, %v829_v10  ;;  %v344_v41 = vadd.f32 %v328_v62, %v311_v20  ;;  %v545_v50 = vrot.slane %v488_v23, 1  ;;  %v852_v42 = vmul.f32 %v1746_v12, %v2022_v13 }
  0x71   : > { %v425_v45 = vsel %vm400_vm1, %v422_v44, %v424_v36  ;;  %v666_v33 = vrot.slane %v609_v37, 1  ;;  %v788_v46 = vrot.slane %v730_v38, 2  ;;  %v973_v47 = vmul.f32 %v1777_v32, %v2097_v22 }
  0x72   : > { %v1071_v53 = vadd.f32 %v1029_v34, %v950_v40  ;;  %v466_v39 = vadd.f32 %v425_v45, %v344_v41  ;;  %v546_v8 = vsel %vm400_vm1, %v543_v48, %v545_v50  ;;  %v909_v52 = vrot.slane %v852_v42, 2 }
  0x73   : > { %v667_v35 = vsel %vm400_vm1, %v664_v30, %v666_v33  ;;  %v789_v55 = vsel %vm764_vm2, %v786_v49, %v788_v46  ;;  %v1030_v56 = vrot.slane %v973_v47, 2  ;;  %v279_v44 = vmul.f32 %v1722_v2, %v1972_v43 }
  0x74   : > { %v1091_v57 = vadd.f32 %v1824_v26, %v1071_v53  ;;  %v587_v58 = vadd.f32 %v546_v8, %v466_v39  ;;  %v910_v60 = vsel %vm764_vm2, %v907_v51, %v909_v52  ;;  %v296_v63 = vmul.f32 %v1724_v3, %v2047_v15 }
  0x75   : > { %v1031_v48 = vsel %vm764_vm2, %v1028_v27, %v1030_v56  ;;  %v329_v30 = vmul.f32 %v1731_v5, %v2121_v14  ;;  %v367_v49 = vmul.f32 %v1726_v4, %v1972_v43  ;;  %v2141_v61 = vmul.f32 %v1726_v4, %v1984_v54 }
  0x76   : > { %v1107_v9 = vmax.f32 %v1091_v57, 0.0  ;;  %v708_v16 = vadd.f32 %v667_v35, %v587_v58  ;;  %v312_v17 = vadd.f32 %v296_v63, %v279_v44  ;;  %v489_v51 = vmul.f32 %v1733_v6, %v2047_v15  ;;  %v2171_v35 = vld [vmem:[%s1735_s28 + $0xb8] sm:$0x3] }
  0x77   : > { %v426_v59 = vrot.slane %v367_v49, 1  ;;  %v427_v0 = vrot.slane %v2141_v61, 1  ;;  %v490_v31 = vmul.f32 %v1733_v6, %v2058_v28  ;;  %v610_v19 = vmul.f32 %v1737_v7, %v2121_v14 }
  0x78   : > { %1490 = vmatmul.msk.f32.vlgmr.msra.gmra.mxu2 %vm1120_vm3, %v1107_v9  ;;  %v830_v21 = vadd.f32 %v789_v55, %v708_v16  ;;  %v345_v24 = vadd.f32 %v329_v30, %v312_v17  ;;  %v547_v25 = vrot.slane %v489_v51, 1  ;;  %v611_v27 = vmul.f32 %v1737_v7, %v2133_v1 }
  0x79   : > { %v428_v62 = vsel %vm400_vm1, %v426_v59, %v427_v0  ;;  %v548_v29 = vrot.slane %v490_v31, 1  ;;  %v668_v18 = vrot.slane %v610_v19, 1  ;;  %v731_v10 = vmul.f32 %v1744_v11, %v1972_v43 }
  0x7a   : > { %v951_v20 = vadd.f32 %v910_v60, %v830_v21  ;;  %v467_v23 = vadd.f32 %v428_v62, %v345_v24  ;;  %v669_v34 = vrot.slane %v611_v27, 1  ;;  %v732_v36 = vmul.f32 %v1744_v11, %v1984_v54 }
  0x7b   : > { %v549_v37 = vsel %vm400_vm1, %v547_v25, %v548_v29  ;;  %v790_v38 = vrot.slane %v731_v10, 2  ;;  %v853_v40 = vmul.f32 %v1746_v12, %v2047_v15  ;;  %v854_v41 = vmul.f32 %v1746_v12, %v2058_v28  ;;  %v2196_v10 = vld [vmem:[%s1735_s28 + $0xc0] sm:$0xff] }
  0x7c   : > { %v1072_v50 = vadd.f32 %v1031_v48, %v951_v20  ;;  %v588_v42 = vadd.f32 %v549_v37, %v467_v23  ;;  %v670_v43 = vsel %vm400_vm1, %v668_v18, %v669_v34  ;;  %v791_v45 = vrot.slane %v732_v36, 2 }
  0x7d   : > { %v911_v33 = vrot.slane %v853_v40, 2  ;;  %v912_v46 = vrot.slane %v854_v41, 2  ;;  %v974_v47 = vmul.f32 %v1777_v32, %v2121_v14  ;;  %v975_v53 = vmul.f32 %v1777_v32, %v2133_v1 }
  0x7e   : > { %v1092_v39 = vadd.f32 %v1824_v26, %v1072_v50  ;;  %v709_v8 = vadd.f32 %v670_v43, %v588_v42  ;;  %v792_v52 = vsel %vm764_vm2, %v790_v38, %v791_v45  ;;  %v280_v55 = vmul.f32 %v1722_v2, %v1984_v54  ;;  %v2207_v42 = vld [vmem:[%s1735_s28 + $0xc8] sm:$0xff] }
  0x7f   : > { %v913_v56 = vsel %vm764_vm2, %v911_v33, %v912_v46  ;;  %v1032_v44 = vrot.slane %v974_v47, 2  ;;  %v1033_v57 = vrot.slane %v975_v53, 2  ;;  %v297_v58 = vmul.f32 %v1724_v3, %v2058_v28 }
  0x80   : > { %v1108_v60 = vmax.f32 %v1092_v39, 0.0  ;;  %v831_v63 = vadd.f32 %v792_v52, %v709_v8  ;;  %v330_v48 = vmul.f32 %v1731_v5, %v2133_v1  ;;  %v369_v30 = vmul.f32 %v1726_v4, %v2022_v13 }
  0x81   : > { %v1034_v49 = vsel %vm764_vm2, %v1032_v44, %v1033_v57  ;;  %v313_v61 = vadd.f32 %v297_v58, %v280_v55  ;;  %v491_v54 = vmul.f32 %v1733_v6, %v2097_v22  ;;  %v612_v9 = vmul.f32 %v1737_v7, %v2171_v35 }
  0x82   : > { %1491 = vmatmul.msk.f32.gmra.mxu2 %vm1120_vm3, %v1108_v60  ;;  %v952_v16 = vadd.f32 %v913_v56, %v831_v63  ;;  %v429_v17 = vrot.slane %v369_v30, 1  ;;  %v733_v51 = vmul.f32 %v1744_v11, %v2022_v13  ;;  %v855_v59 = vmul.f32 %v1746_v12, %v2097_v22 }
  0x83   : > { %v346_v31 = vadd.f32 %v330_v48, %v313_v61  ;;  %v550_v19 = vrot.slane %v491_v54, 1  ;;  %v671_v21 = vrot.slane %v612_v9, 1  ;;  %v976_v24 = vmul.f32 %v1777_v32, %v2171_v35 }
  0x84   : > { %v1073_v25 = vadd.f32 %v1034_v49, %v952_v16  ;;  %v430_v27 = vsel %vm400_vm1, %v427_v0, %v429_v17  ;;  %v793_v62 = vrot.slane %v733_v51, 2  ;;  %v914_v18 = vrot.slane %v855_v59, 2 }
  0x85   : > { %v468_v20 = vadd.f32 %v430_v27, %v346_v31  ;;  %v551_v13 = vsel %vm400_vm1, %v548_v29, %v550_v19  ;;  %v672_v23 = vsel %vm400_vm1, %v669_v34, %v671_v21  ;;  %v1035_v36 = vrot.slane %v976_v24, 2 }
  0x86   : > { %v1093_v37 = vadd.f32 %v1824_v26, %v1073_v25  ;;  %v794_v38 = vsel %vm764_vm2, %v791_v45, %v793_v62  ;;  %v915_v40 = vsel %vm764_vm2, %v912_v46, %v914_v18  ;;  %v281_v41 = vmul.f32 %v1722_v2, %v2047_v15 }
  0x87   : > { %v589_v0 = vadd.f32 %v551_v13, %v468_v20  ;;  %v1036_v50 = vsel %vm764_vm2, %v1033_v57, %v1035_v36  ;;  %v298_v29 = vmul.f32 %v1724_v3, %v2121_v14  ;;  %v331_v34 = vmul.f32 %v1731_v5, %v2196_v10 }
  0x88   : > { %v1109_v43 = vmax.f32 %v1093_v37, 0.0  ;;  %v370_v45 = vmul.f32 %v1726_v4, %v2047_v15  ;;  %v371_v33 = vmul.f32 %v1726_v4, %v2058_v28  ;;  %v492_v46 = vmul.f32 %v1733_v6, %v2121_v14  ;;  %v2246_v37 = vld [vmem:[%s1735_s28 + $0xd0] sm:$0x3] }
  0x89   : > { %v710_v47 = vadd.f32 %v672_v23, %v589_v0  ;;  %v314_v53 = vadd.f32 %v298_v29, %v281_v41  ;;  %v493_v39 = vmul.f32 %v1733_v6, %v2133_v1  ;;  %v613_v8 = vmul.f32 %v1737_v7, %v2196_v10 }
  0x8a   : > { %1492 = vmatmul.msk.f32.gmra.mxu2 %vm1120_vm3, %v1109_v43  ;;  %v431_v52 = vrot.slane %v370_v45, 1  ;;  %v432_v55 = vrot.slane %v371_v33, 1  ;;  %v552_v56 = vrot.slane %v492_v46, 1  ;;  %v614_v44 = vmul.f32 %v1737_v7, %v2207_v42 }
  0x8b   : > { %v832_v57 = vadd.f32 %v794_v38, %v710_v47  ;;  %v347_v58 = vadd.f32 %v331_v34, %v314_v53  ;;  %v553_v60 = vrot.slane %v493_v39, 1  ;;  %v673_v63 = vrot.slane %v613_v8, 1 }
  0x8c   : > { %v433_v48 = vsel %vm400_vm1, %v431_v52, %v432_v55  ;;  %v674_v30 = vrot.slane %v614_v44, 1  ;;  %v734_v49 = vmul.f32 %v1744_v11, %v2047_v15  ;;  %v735_v61 = vmul.f32 %v1744_v11, %v2058_v28 }
  0x8d   : > { %v953_v54 = vadd.f32 %v915_v40, %v832_v57  ;;  %v469_v9 = vadd.f32 %v433_v48, %v347_v58  ;;  %v554_v16 = vsel %vm400_vm1, %v552_v56, %v553_v60  ;;  %v856_v17 = vmul.f32 %v1746_v12, %v2121_v14  ;;  %v2269_v57 = vld [vmem:[%s2426_s1 + $0x8] ss:$0 sm:$0xff] }
  0x8e   : > { %v675_v51 = vsel %vm400_vm1, %v673_v63, %v674_v30  ;;  %v795_v59 = vrot.slane %v734_v49, 2  ;;  %v796_v31 = vrot.slane %v735_v61, 2  ;;  %v857_v19 = vmul.f32 %v1746_v12, %v2133_v1  ;;  %v263_v61 = vld [vmem:[%s1735_s28 + $0xd8] sm:$0xff] }
  0x8f   : > { %v1074_v21 = vadd.f32 %v1036_v50, %v953_v54  ;;  %v590_v15 = vadd.f32 %v554_v16, %v469_v9  ;;  %v916_v24 = vrot.slane %v856_v17, 2  ;;  %v977_v25 = vmul.f32 %v1777_v32, %v2196_v10 }
  0x90   : > { %v797_v27 = vsel %vm764_vm2, %v795_v59, %v796_v31  ;;  %v917_v62 = vrot.slane %v857_v19, 2  ;;  %v978_v18 = vmul.f32 %v1777_v32, %v2207_v42  ;;  %v282_v20 = vmul.f32 %v1722_v2, %v2058_v28  ;;  %v264_v19 = vld [vmem:[%s1735_s28 + $0xe0] sm:$0xff] }
  0x91   : > { %v1094_v13 = vadd.f32 %v1824_v26, %v1074_v21  ;;  %v711_v23 = vadd.f32 %v675_v51, %v590_v15  ;;  %v1037_v36 = vrot.slane %v977_v25, 2  ;;  %v299_v38 = vmul.f32 %v1724_v3, %v2133_v1 }
  0x92   : > { %v918_v40 = vsel %vm764_vm2, %v916_v24, %v917_v62  ;;  %v1038_v41 = vrot.slane %v978_v18, 2  ;;  %v332_v0 = vmul.f32 %v1731_v5, %v2207_v42  ;;  %v372_v32 = vmul.f32 %v1726_v4, %v2097_v22 }
  0x93   : > { %v1110_v50 = vmax.f32 %v1094_v13, 0.0  ;;  %v833_v28 = vadd.f32 %v797_v27, %v711_v23  ;;  %v315_v29 = vadd.f32 %v299_v38, %v282_v20  ;;  %v494_v34 = vmul.f32 %v1733_v6, %v2171_v35 }
  0x94   : > { %v1039_v43 = vsel %vm764_vm2, %v1037_v36, %v1038_v41  ;;  %v434_v45 = vrot.slane %v372_v32, 1  ;;  %v615_v33 = vmul.f32 %v1737_v7, %v2246_v37  ;;  %v736_v46 = vmul.f32 %v1744_v11, %v2097_v22 }
  0x95   : > { %1493 = vmatmul.msk.f32.gmra.mxu2 %vm1120_vm3, %v1110_v50  ;;  %v954_v47 = vadd.f32 %v918_v40, %v833_v28  ;;  %v348_v53 = vadd.f32 %v332_v0, %v315_v29  ;;  %v555_v39 = vrot.slane %v494_v34, 1  ;;  %v858_v8 = vmul.f32 %v1746_v12, %v2171_v35 }
  0x96   : > { %v435_v52 = vsel %vm400_vm1, %v432_v55, %v434_v45  ;;  %v676_v56 = vrot.slane %v615_v33, 1  ;;  %v798_v44 = vrot.slane %v736_v46, 2  ;;  %v979_v22 = vmul.f32 %v2269_v57, %v2246_v37 }
  0x97   : > { %v1075_v58 = vadd.f32 %v1039_v43, %v954_v47  ;;  %v470_v63 = vadd.f32 %v435_v52, %v348_v53  ;;  %v556_v48 = vsel %vm400_vm1, %v553_v60, %v555_v39  ;;  %v919_v49 = vrot.slane %v858_v8, 2 }
  0x98   : > { %v677_v54 = vsel %vm400_vm1, %v674_v30, %v676_v56  ;;  %v799_v55 = vsel %vm764_vm2, %v796_v31, %v798_v44  ;;  %v1040_v9 = vrot.slane %v979_v22, 2  ;;  %v283_v16 = vmul.f32 %v1722_v2, %v2121_v14  ;;  %v1567_v22 = vld [vmem:[%s2427_s2] ss:$0 sm:$0xff] }
  0x99   : > { %v1095_v17 = vadd.f32 %v1824_v26, %v1075_v58  ;;  %v591_v51 = vadd.f32 %v556_v48, %v470_v63  ;;  %v920_v59 = vsel %vm764_vm2, %v917_v62, %v919_v49  ;;  %v300_v21 = vmul.f32 %v1724_v3, %v2196_v10  ;;  %v265_v48 = vld [vmem:[%s1735_s28 + $0xe8] sm:$0x3]  ;;  %s1310_s28 = sadd.s32 (%p1700_p5), %s1606_s20, %s1499_s18 }
  0x9a   : > { %v1041_v60 = vsel %vm764_vm2, %v1038_v41, %v1040_v9  ;;  %v333_v15 = vmul.f32 %v1731_v5, %v263_v61  ;;  %v334_v30 = vmul.f32 %v1731_v5, %v264_v19  ;;  %v373_v31 = vmul.f32 %v1726_v4, %v2121_v14  ;;  %s1500_s30 = sshll.u32 (%p1700_p5), %s1310_s28, 3 }
  0x9b   : > { %v1111_v24 = vmax.f32 %v1095_v17, 0.0  ;;  %v712_v25 = vadd.f32 %v677_v54, %v591_v51  ;;  %v316_v27 = vadd.f32 %v300_v21, %v283_v16  ;;  %v374_v26 = vmul.f32 %v1726_v4, %v2133_v1  ;;  %s1312_s29 = scalar_lea.vmem (%p1700_p5), %s2430_s5, %s1500_s30 }
  0x9c   : > { %v436_v62 = vrot.slane %v373_v31, 1  ;;  %v495_v18 = vmul.f32 %v1733_v6, %v2196_v10  ;;  %v496_v20 = vmul.f32 %v1733_v6, %v2207_v42  ;;  %v616_v13 = vmul.f32 %v1737_v7, %v263_v61 }
  0x9d   : > { %1494 = vmatmul.msk.f32.vlgmr.msra.gmra.mxu3 %vm1120_vm3, %v1111_v24  ;;  %v834_v5 = vadd.f32 %v799_v55, %v712_v25  ;;  %v349_v23 = vadd.f32 %v333_v15, %v316_v27  ;;  %v437_v36 = vrot.slane %v374_v26, 1  ;;  %v617_v38 = vmul.f32 %v1737_v7, %v264_v19 }
  0x9e   : > { %v557_v40 = vrot.slane %v495_v18, 1  ;;  %v558_v41 = vrot.slane %v496_v20, 1  ;;  %v678_v0 = vrot.slane %v616_v13, 1  ;;  %v737_v32 = vmul.f32 %v1744_v11, %v2121_v14  ;;  %v2338_v18 = vld [vmem:[%s2429_s4] ss:$0 sm:$0xff] }
  0x9f   : > { %v955_v50 = vadd.f32 %v920_v59, %v834_v5  ;;  %v438_v28 = vsel %vm400_vm1, %v436_v62, %v437_v36  ;;  %v679_v29 = vrot.slane %v617_v38, 1  ;;  %v738_v34 = vmul.f32 %v1744_v11, %v2133_v1 }
  0xa0   : > { %v471_v43 = vadd.f32 %v438_v28, %v349_v23  ;;  %v559_v45 = vsel %vm400_vm1, %v557_v40, %v558_v41  ;;  %v800_v33 = vrot.slane %v737_v32, 2  ;;  %v859_v46 = vmul.f32 %v1746_v12, %v2196_v10 }
  0xa1   : > { %v1076_v47 = vadd.f32 %v1041_v60, %v955_v50  ;;  %v680_v53 = vsel %vm400_vm1, %v678_v0, %v679_v29  ;;  %v801_v39 = vrot.slane %v738_v34, 2  ;;  %v860_v14 = vmul.f32 %v1746_v12, %v2207_v42 }
  0xa2   : > { %v592_v8 = vadd.f32 %v559_v45, %v471_v43  ;;  %v921_v52 = vrot.slane %v859_v46, 2  ;;  %v980_v56 = vmul.f32 %v2269_v57, %v263_v61  ;;  %v981_v44 = vmul.f32 %v2269_v57, %v264_v19 }
  0xa3   : > { %v1096_v58 = vadd.f32 %v1567_v22, %v1076_v47  ;;  %v802_v10 = vsel %vm764_vm2, %v800_v33, %v801_v39  ;;  %v922_v63 = vrot.slane %v860_v14, 2  ;;  %v284_v49 = vmul.f32 %v1722_v2, %v2133_v1 }
  0xa4   : > { %v713_v54 = vadd.f32 %v680_v53, %v592_v8  ;;  %v1042_v55 = vrot.slane %v980_v56, 2  ;;  %v1043_v9 = vrot.slane %v981_v44, 2  ;;  %v301_v61 = vmul.f32 %v1724_v3, %v2207_v42 }
  0xa5   : > { %v1112_v16 = vmax.f32 %v1096_v58, 0.0  ;;  %v923_v17 = vsel %vm764_vm2, %v921_v52, %v922_v63  ;;  %v375_v51 = vmul.f32 %v1726_v4, %v2171_v35  ;;  %v497_v59 = vmul.f32 %v1733_v6, %v2246_v37 }
  0xa6   : > { %v835_v19 = vadd.f32 %v802_v10, %v713_v54  ;;  %v1044_v21 = vsel %vm764_vm2, %v1042_v55, %v1043_v9  ;;  %v317_v60 = vadd.f32 %v301_v61, %v284_v49  ;;  %v618_v2 = vmul.f32 %v1737_v7, %v265_v48 }
  0xa7   : > { %1495 = vmatmul.msk.f32.gmra.mxu3 %vm1120_vm3, %v1112_v16  ;;  %v439_v1 = vrot.slane %v375_v51, 1  ;;  %v560_v15 = vrot.slane %v497_v59, 1  ;;  %v739_v3 = vmul.f32 %v1744_v11, %v2171_v35  ;;  %v861_v42 = vmul.f32 %v1746_v12, %v2246_v37 }
  0xa8   : > { %v956_v4 = vadd.f32 %v923_v17, %v835_v19  ;;  %v350_v31 = vadd.f32 %v334_v30, %v317_v60  ;;  %v681_v24 = vrot.slane %v618_v2, 1  ;;  %v982_v7 = vmul.f32 %v2269_v57, %v265_v48 }
  0xa9   : > { %v440_v6 = vsel %vm400_vm1, %v437_v36, %v439_v1  ;;  %v561_v25 = vsel %vm400_vm1, %v558_v41, %v560_v15  ;;  %v803_v27 = vrot.slane %v739_v3, 2  ;;  %v924_v12 = vrot.slane %v861_v42, 2 }
  0xaa   : > { %v1077_v26 = vadd.f32 %v1044_v21, %v956_v4  ;;  %v472_v62 = vadd.f32 %v440_v6, %v350_v31  ;;  %v682_v11 = vsel %vm400_vm1, %v679_v29, %v681_v24  ;;  %v1045_v20 = vrot.slane %v982_v7, 2 }
  0xab   : > { %v804_v30 = vsel %vm764_vm2, %v801_v39, %v803_v27  ;;  %v925_v36 = vsel %vm764_vm2, %v922_v63, %v924_v12 }
  0xac   : > { %v1097_v35 = vadd.f32 %v1567_v22, %v1077_v26  ;;  %v593_v37 = vadd.f32 %v561_v25, %v472_v62  ;;  %v1046_v41 = vsel %vm764_vm2, %v1043_v9, %v1045_v20 }
  0xad   : > { %v1190_v13 = vpop.f32.mrf.mxu0 }
  0xae   : > { %v1113_v5 = vmax.f32 %v1097_v35, 0.0  ;;  %v714_v23 = vadd.f32 %v682_v11, %v593_v37  ;;  %v1191_v57 = vadd.f32 %v2338_v18, %v1190_v13 }
  0xb0   : > { %1496 = vmatmul.msk.f32.gmra.mxu3 %vm1120_vm3, %v1113_v5  ;;  %v836_v38 = vadd.f32 %v804_v30, %v714_v23  ;;  %v1238_v40 = vmax.f32 %v1191_v57, 0.0 }
  0xb2   : > { %v957_v0 = vadd.f32 %v925_v36, %v836_v38  ;;  %1254 = vxpose.xlu0.b32.start [1/16] %v1238_v40, 128 }
  0xb4   : > { %v1078_v32 = vadd.f32 %v1046_v41, %v957_v0 }
  0xb5   : > { %v1193_v50 = vpop.f32.mrf.mxu0 }
  0xb6   : > { %v1098_v28 = vadd.f32 %v1567_v22, %v1078_v32  ;;  %v1194_v29 = vadd.f32 %v2338_v18, %v1193_v50 }
  0xb8   : > { %v1114_v34 = vmax.f32 %v1098_v28, 0.0  ;;  %v1239_v43 = vmax.f32 %v1194_v29, 0.0 }
  0xba   : > { %1497 = vmatmul.msk.f32.gmra.mxu3 %vm1120_vm3, %v1114_v34  ;;  %1255 = vxpose.xlu0.b32.cont [2/16] %v1239_v43, 128 }
  0xbd   : > { %v1196_v45 = vpop.f32.mrf.mxu0 }
  0xbe   : > { %v1197_v33 = vadd.f32 %v2338_v18, %v1196_v45 }
  0xc0   : > { %v1240_v46 = vmax.f32 %v1197_v33, 0.0 }
  0xc2   : > { %1256 = vxpose.xlu0.b32.cont [3/16] %v1240_v46, 128 }
  0xc8   : > { %v1199_v47 = vpop.f32.mrf.mxu0 }
  0xc9   : > { %v1200_v53 = vadd.f32 %v2338_v18, %v1199_v47 }
  0xcb   : > { %v1241_v39 = vmax.f32 %v1200_v53, 0.0 }
  0xcd   : > { %1257 = vxpose.xlu0.b32.cont [4/16] %v1241_v39, 128 }
  0xd0   : > { %v1202_v14 = vpop.f32.mrf.mxu1 }
  0xd1   : > { %v1203_v8 = vadd.f32 %v2338_v18, %v1202_v14 }
  0xd3   : > { %v1242_v52 = vmax.f32 %v1203_v8, 0.0 }
  0xd5   : > { %1258 = vxpose.xlu0.b32.cont [5/16] %v1242_v52, 128 }
  0xda   : > { %v1205_v56 = vpop.f32.mrf.mxu1 }
  0xdb   : > { %v1206_v44 = vadd.f32 %v2338_v18, %v1205_v56 }
  0xdd   : > { %v1243_v22 = vmax.f32 %v1206_v44, 0.0 }
  0xdf   : > { %1259 = vxpose.xlu0.b32.cont [6/16] %v1243_v22, 128 }
  0xe2   : > { %v1208_v58 = vpop.f32.mrf.mxu1 }
  0xe3   : > { %v1209_v10 = vadd.f32 %v2338_v18, %v1208_v58 }
  0xe5   : > { %v1244_v63 = vmax.f32 %v1209_v10, 0.0 }
  0xe7   : > { %1260 = vxpose.xlu0.b32.cont [7/16] %v1244_v63, 128 }
  0xed   : > { %v1211_v48 = vpop.f32.mrf.mxu1 }
  0xee   : > { %v1212_v49 = vadd.f32 %v2338_v18, %v1211_v48 }
  0xf0   : > { %v1245_v54 = vmax.f32 %v1212_v49, 0.0 }
  0xf2   : > { %1261 = vxpose.xlu0.b32.cont [8/16] %v1245_v54, 128 }
  0xfb   : > { %v1214_v55 = vpop.f32.mrf.mxu2 }
  0xfc   : > { %v1215_v9 = vadd.f32 %v2338_v18, %v1214_v55 }
  0xfe   : > { %v1246_v61 = vmax.f32 %v1215_v9, 0.0 }
 0x100   : > { %1262 = vxpose.xlu0.b32.cont [9/16] %v1246_v61, 128 }
 0x105   : > { %v1217_v16 = vpop.f32.mrf.mxu2 }
 0x106   : > { %v1218_v17 = vadd.f32 %v2338_v18, %v1217_v16 }
 0x108   : > { %v1247_v51 = vmax.f32 %v1218_v17, 0.0 }
 0x10a   : > { %1263 = vxpose.xlu0.b32.cont [10/16] %v1247_v51, 128 }
 0x10d   : > { %v1220_v59 = vpop.f32.mrf.mxu2 }
 0x10e   : > { %v1221_v19 = vadd.f32 %v2338_v18, %v1220_v59 }
 0x110   : > { %v1248_v21 = vmax.f32 %v1221_v19, 0.0 }
 0x112   : > { %1264 = vxpose.xlu0.b32.cont [11/16] %v1248_v21, 128 }
 0x118   : > { %v1223_v60 = vpop.f32.mrf.mxu2 }
 0x119   : > { %v1224_v2 = vadd.f32 %v2338_v18, %v1223_v60 }
 0x11b   : > { %v1249_v1 = vmax.f32 %v1224_v2, 0.0 }
 0x11d   : > { %1265 = vxpose.xlu0.b32.cont [12/16] %v1249_v1, 128 }
 0x120   : > { %v1226_v15 = vpop.f32.mrf.mxu3 }
 0x121   : > { %v1227_v3 = vadd.f32 %v2338_v18, %v1226_v15 }
 0x123   : > { %v1250_v42 = vmax.f32 %v1227_v3, 0.0 }
 0x125   : > { %1266 = vxpose.xlu0.b32.cont [13/16] %v1250_v42, 128 }
 0x12a   : > { %v1229_v4 = vpop.f32.mrf.mxu3 }
 0x12b   : > { %v1230_v31 = vadd.f32 %v2338_v18, %v1229_v4 }
 0x12d   : > { %v1251_v24 = vmax.f32 %v1230_v31, 0.0 }
 0x12f   : > { %1267 = vxpose.xlu0.b32.cont [14/16] %v1251_v24, 128 }
 0x133   : > { %v1232_v6 = vpop.f32.mrf.mxu3 }
 0x134   : > { %v1233_v25 = vadd.f32 %v2338_v18, %v1232_v6 }
 0x136   : > { %v1252_v27 = vmax.f32 %v1233_v25, 0.0 }
 0x138   : > { %1268 = vxpose.xlu0.b32.cont [15/16] %v1252_v27, 128 }
 0x13d   : > { %v1235_v7 = vpop.f32.mrf.mxu3 }
 0x13e   : > { %v1236_v26 = vadd.f32 %v2338_v18, %v1235_v7 }
 0x140   : > { %v1253_v62 = vmax.f32 %v1236_v26, 0.0 }
 0x142   : > { %1269 = vxpose.xlu0.b32.end [16/16] %v1253_v62, 128 }
 0x16e   : > { %v1270_v11 = vpop.trf.xlu0 }
 0x16f   : > { %1286 = vst [vmem:[%s2363_s27] sm:$0xff] %v1270_v11 }
 0x176   : > { %v1271_v12 = vpop.trf.xlu0  ;;  %v1371_v32 = vld [vmem:[%s2363_s27] sm:$0xff] (%p1700_p5) }
 0x177   : > { %1287 = vst [vmem:[%s2363_s27 + $0x8] sm:$0xff] %v1271_v12 }
 0x178   : > { %1372 = vst [vmem:[%s1312_s29] sm:$0xff] (%p1700_p5), %v1371_v32 }
 0x17e   : > { %v1272_v18 = vpop.trf.xlu0  ;;  %v1373_v50 = vld [vmem:[%s2363_s27 + $0x8] sm:$0xff] (%p1700_p5) }
 0x17f   : > { %1288 = vst [vmem:[%s2363_s27 + $0x10] sm:$0xff] %v1272_v18 }
 0x180   : > { %1374 = vst [vmem:[%s1312_s29 + $0x10] sm:$0xff] (%p1700_p5), %v1373_v50 }
 0x186   : > { %v1273_v35 = vpop.trf.xlu0  ;;  %v1375_v28 = vld [vmem:[%s2363_s27 + $0x10] sm:$0xff] (%p1700_p5) }
 0x187   : > { %1289 = vst [vmem:[%s2363_s27 + $0x18] sm:$0xff] %v1273_v35 }
 0x188   : > { %1376 = vst [vmem:[%s1312_s29 + $0x20] sm:$0xff] (%p1700_p5), %v1375_v28 }
 0x18e   : > { %v1274_v37 = vpop.trf.xlu0  ;;  %v1377_v29 = vld [vmem:[%s2363_s27 + $0x18] sm:$0xff] (%p1700_p5) }
 0x18f   : > { %1290 = vst [vmem:[%s2363_s27 + $0x20] sm:$0xff] %v1274_v37 }
 0x190   : > { %1378 = vst [vmem:[%s1312_s29 + $0x30] sm:$0xff] (%p1700_p5), %v1377_v29 }
 0x196   : > { %v1275_v30 = vpop.trf.xlu0  ;;  %v1379_v34 = vld [vmem:[%s2363_s27 + $0x20] sm:$0xff] (%p1700_p5) }
 0x197   : > { %1291 = vst [vmem:[%s2363_s27 + $0x28] sm:$0xff] %v1275_v30 }
 0x198   : > { %1380 = vst [vmem:[%s1312_s29 + $0x40] sm:$0xff] (%p1700_p5), %v1379_v34 }
 0x19e   : > { %v1276_v20 = vpop.trf.xlu0  ;;  %v1381_v43 = vld [vmem:[%s2363_s27 + $0x28] sm:$0xff] (%p1700_p5) }
 0x19f   : > { %1292 = vst [vmem:[%s2363_s27 + $0x30] sm:$0xff] %v1276_v20 }
 0x1a0   : > { %1382 = vst [vmem:[%s1312_s29 + $0x50] sm:$0xff] (%p1700_p5), %v1381_v43 }
 0x1a6   : > { %v1277_v13 = vpop.trf.xlu0  ;;  %v1383_v45 = vld [vmem:[%s2363_s27 + $0x30] sm:$0xff] (%p1700_p5) }
 0x1a7   : > { %1293 = vst [vmem:[%s2363_s27 + $0x38] sm:$0xff] %v1277_v13 }
 0x1a8   : > { %1384 = vst [vmem:[%s1312_s29 + $0x60] sm:$0xff] (%p1700_p5), %v1383_v45 }
 0x1ae   : > { %v1278_v5 = vpop.trf.xlu0  ;;  %v1385_v33 = vld [vmem:[%s2363_s27 + $0x38] sm:$0xff] (%p1700_p5) }
 0x1af   : > { %1294 = vst [vmem:[%s2363_s27 + $0x40] sm:$0xff] %v1278_v5 }
 0x1b0   : > { %1386 = vst [vmem:[%s1312_s29 + $0x70] sm:$0xff] (%p1700_p5), %v1385_v33 }
 0x1b6   : > { %v1279_v23 = vpop.trf.xlu0  ;;  %v1387_v46 = vld [vmem:[%s2363_s27 + $0x40] sm:$0xff] (%p1700_p5) }
 0x1b7   : > { %1295 = vst [vmem:[%s2363_s27 + $0x48] sm:$0xff] %v1279_v23 }
 0x1b8   : > { %1388 = vst [vmem:[%s1312_s29 + $0x80] sm:$0xff] (%p1700_p5), %v1387_v46 }
 0x1be   : > { %v1280_v57 = vpop.trf.xlu0  ;;  %v1389_v47 = vld [vmem:[%s2363_s27 + $0x48] sm:$0xff] (%p1700_p5) }
 0x1bf   : > { %1296 = vst [vmem:[%s2363_s27 + $0x50] sm:$0xff] %v1280_v57 }
 0x1c0   : > { %1390 = vst [vmem:[%s1312_s29 + $0x90] sm:$0xff] (%p1700_p5), %v1389_v47 }
 0x1c6   : > { %v1281_v36 = vpop.trf.xlu0  ;;  %v1391_v53 = vld [vmem:[%s2363_s27 + $0x50] sm:$0xff] (%p1700_p5) }
 0x1c7   : > { %1297 = vst [vmem:[%s2363_s27 + $0x58] sm:$0xff] %v1281_v36 }
 0x1c8   : > { %1392 = vst [vmem:[%s1312_s29 + $0xa0] sm:$0xff] (%p1700_p5), %v1391_v53 }
 0x1ce   : > { %v1282_v38 = vpop.trf.xlu0  ;;  %v1393_v39 = vld [vmem:[%s2363_s27 + $0x58] sm:$0xff] (%p1700_p5) }
 0x1cf   : > { %1298 = vst [vmem:[%s2363_s27 + $0x60] sm:$0xff] %v1282_v38 }
 0x1d0   : > { %1394 = vst [vmem:[%s1312_s29 + $0xb0] sm:$0xff] (%p1700_p5), %v1393_v39 }
 0x1d6   : > { %v1283_v40 = vpop.trf.xlu0  ;;  %v1395_v14 = vld [vmem:[%s2363_s27 + $0x60] sm:$0xff] (%p1700_p5) }
 0x1d7   : > { %1299 = vst [vmem:[%s2363_s27 + $0x68] sm:$0xff] %v1283_v40 }
 0x1d8   : > { %1396 = vst [vmem:[%s1312_s29 + $0xc0] sm:$0xff] (%p1700_p5), %v1395_v14 }
 0x1de   : > { %v1284_v41 = vpop.trf.xlu0  ;;  %v1397_v8 = vld [vmem:[%s2363_s27 + $0x68] sm:$0xff] (%p1700_p5) }
 0x1df   : > { %1300 = vst [vmem:[%s2363_s27 + $0x70] sm:$0xff] %v1284_v41 }
 0x1e0   : > { %1398 = vst [vmem:[%s1312_s29 + $0xd0] sm:$0xff] (%p1700_p5), %v1397_v8 }
 0x1e3   : > { %1308 = sbr.rel (!%p1700_p5) target bundleno = 496 (0x1f0), region = 44 }
 0x1e6   : > { %v1285_v0 = vpop.trf.xlu0  ;;  %v1399_v52 = vld [vmem:[%s2363_s27 + $0x70] sm:$0xff] (%p1700_p5) }
 0x1e7   : > { %1301 = vst [vmem:[%s2363_s27 + $0x78] sm:$0xff] %v1285_v0 }
 0x1e8   : > { %1400 = vst [vmem:[%s1312_s29 + $0xe0] sm:$0xff] %v1399_v52 }
 0x1ee   : > { %v1401_v56 = vld [vmem:[%s2363_s27 + $0x78] sm:$0xff] }
 0x1ef   : > { %1402 = vst [vmem:[%s1312_s29 + $0xf0] sm:$0xff] %v1401_v56 }
 0x1f0 PF: > { %s15_s24 = sadd.s32 1, %s1622_s24   ;;  %s2432_s18 = smov %s1602_s19 }
 0x1f1   : > { %p12_p10 = scmp.ge.s32.totalorder %s15_s24, 6   ;;  %s2433_s19 = smov %s1711_s8 }
 0x1f2   : > { %s2434_s20 = smov %s1614_s22  ;;  %s2435_s21 = smov %s1618_s23 }
 0x1f3   : > { %s2436_s22 = smov %s2439_s25  ;;  %s2437_s23 = smov %s2443_s26 }
 0x1f4   :  { %14 = sbr.rel (!%p12_p10) target bundleno = 4 (0x4), region = 109 }

</bundles_post_ra>
